<compile_context>
chip_gen: v7x
topology: tpu7x:2x2x1
jax: 0.10.0
libtpu: 0.0.40
codegen_flags: <defaults>
</compile_context>

<pallas_src>
import jax
import jax.numpy as jnp
from jax import lax
from jax.experimental import pallas as pl
from jax.experimental.pallas import tpu as pltpu

C_IN, C_OUT, KH, KW = 3, 32, 7, 7
NUM_CLASSES = 10
H_IN = W_IN = 32
OH, OW = H_IN - KH + 1, W_IN - KW + 1        # 26, 26
PH, PW = OH // 2, OW // 2                    # 13, 13
P = PH * PW                                  # 169
P_PAD = 176                                  # 169 rounded up to a multiple of 8
KPROD = C_IN * KH * KW                       # 147


# ---------------- fused Pallas kernel ----------------

def _fused_cnn_kernel(p_ref, wc_ref, bc_ref, wf_ref, seg_ref, bf_ref, o_ref,
                      cs_ref):
    # p_ref  : (4, 147, tb*176)  bf16  pool-grouped, transposed im2col patches
    # wc_ref : (32, 147)         bf16  conv weight (channel-major)
    # bc_ref : (32, 1)           f32   conv bias (column)
    # wf_ref : (10, 32, tb*176)  f32   fc weight planes, tiled over images
    # seg_ref: (tb*176, tb)      f32   lane -> image segment-sum matrix
    # bf_ref : (10, 1)           f32   fc bias (column)
    # o_ref  : (10, tb)          f32   logits (class-major; transposed outside)
    # cs_ref : (10, tb*176)      f32   VMEM scratch (per-class channel sums)
    wc = wc_ref[...]

    # Conv for the 4 positions of each 2x2 pool window, fused with the pool:
    # elementwise max of the 4 lane-dense MXU results; bias/ReLU applied once
    # after the max (they commute with it).
    m = jnp.dot(wc, p_ref[0], preferred_element_type=jnp.float32)
    for d in range(1, 4):
        m = jnp.maximum(
            m, jnp.dot(wc, p_ref[d], preferred_element_type=jnp.float32))
    h = jnp.maximum(m + bc_ref[...], 0.0)            # (32, tb*176) pooled+ReLU

    # fc: per class, contract channels on the VPU (multiply + sublane sum),
    # then ONE small MXU matmul with the segment matrix sums the 169 pooled
    # positions of every image (padded lanes have zero weight -> no effect).
    for n in range(NUM_CLASSES):
        cs_ref[pl.ds(n, 1), :] = jnp.sum(h * wf_ref[n], axis=0, keepdims=True)
    logits_t = jnp.dot(cs_ref[...], seg_ref[...],
                       preferred_element_type=jnp.float32)          # (10, tb)
    o_ref[...] = logits_t + bf_ref[...]


# ---------------- wrapper ----------------

def vanilla_cnn_forward(x, w_conv, b_conv, w_fc, b_fc):
    B = x.shape[0]
    assert x.shape == (B, C_IN, H_IN, W_IN)

    # ---- batch tiling: several images per grid step, keep >= 2 grid steps
    tb = 1
    for cand in (8, 4, 2):
        if B % cand == 0 and B // cand >= 2:
            tb = cand
            break
    G = B // tb
    L = tb * P_PAD                               # lane extent per grid step

    # ---- pool-grouped, transposed im2col (trace-time XLA glue, bf16):
    # patches[g, d, k, t*176 + r] = x[g*tb+t, c, 2*pi+di+kh, 2*pj+dj+kw]
    #   d = di*2+dj, k = c*49 + kh*7 + kw, r = pi*13 + pj (r >= 169 is zero pad)
    xb = x.astype(jnp.bfloat16)
    cols = jnp.stack(
        [xb[:, :, kh:kh + OH, kw:kw + OW] for kh in range(KH) for kw in range(KW)],
        axis=2)                                              # (B, 3, 49, 26, 26)
    cols = cols.reshape(B, C_IN, KH * KW, PH, 2, PW, 2)
    pat = cols.transpose(0, 4, 6, 1, 2, 3, 5).reshape(B, 4, KPROD, P)
    pat = jnp.pad(pat, ((0, 0), (0, 0), (0, 0), (0, P_PAD - P)))
    pat = pat.reshape(G, tb, 4, KPROD, P_PAD).transpose(0, 2, 3, 1, 4)
    patches = pat.reshape(G, 4, KPROD, L)                    # (G, 4, 147, L)

    # ---- weights permuted once at trace time to match in-kernel layouts
    w_mat = w_conv.reshape(C_OUT, KPROD).astype(jnp.bfloat16)          # (32, 147)
    b_col = b_conv.reshape(C_OUT, 1).astype(jnp.float32)               # (32, 1)
    # fc planes: wf[n, o, t*176 + r] = w_fc[o*169 + r, n]  (PyTorch NCHW flatten)
    wf = w_fc.reshape(C_OUT, P, NUM_CLASSES).transpose(2, 0, 1)        # (10, 32, 169)
    wf = jnp.pad(wf, ((0, 0), (0, 0), (0, P_PAD - P))).astype(jnp.float32)
    wf_tiled = jnp.tile(wf, (1, 1, tb))                                # (10, 32, L)
    seg = jnp.repeat(jnp.eye(tb, dtype=jnp.float32), P_PAD, axis=0)    # (L, tb)
    bf_col = b_fc.reshape(NUM_CLASSES, 1).astype(jnp.float32)          # (10, 1)

    out = pl.pallas_call(
        _fused_cnn_kernel,
        out_shape=jax.ShapeDtypeStruct((G, NUM_CLASSES, tb), jnp.float32),
        grid=(G,),
        in_specs=[
            pl.BlockSpec((None, 4, KPROD, L), lambda g: (g, 0, 0, 0)),
            pl.BlockSpec((C_OUT, KPROD), lambda g: (0, 0)),
            pl.BlockSpec((C_OUT, 1), lambda g: (0, 0)),
            pl.BlockSpec((NUM_CLASSES, C_OUT, L), lambda g: (0, 0, 0)),
            pl.BlockSpec((L, tb), lambda g: (0, 0)),
            pl.BlockSpec((NUM_CLASSES, 1), lambda g: (0, 0)),
        ],
        out_specs=pl.BlockSpec((None, NUM_CLASSES, tb), lambda g: (g, 0, 0)),
        scratch_shapes=[pltpu.VMEM((NUM_CLASSES, L), jnp.float32)],
        compiler_params=pltpu.CompilerParams(
            dimension_semantics=("parallel",)),
    )(patches, w_mat, b_col, wf_tiled, seg, bf_col)

    # (G, 10, tb) -> (B, 10)
    return out.transpose(0, 2, 1).reshape(B, NUM_CLASSES)


# ---------------- pure-JAX reference (sanity check) ----------------

def reference_forward(x, w_conv, b_conv, w_fc, b_fc):
    y = lax.conv_general_dilated(
        x, w_conv, window_strides=(1, 1), padding="VALID",
        dimension_numbers=("NCHW", "OIHW", "NCHW"),
        precision=lax.Precision.HIGHEST)
    y = jnp.maximum(y + b_conv[None, :, None, None], 0.0)
    B, C, H, W = y.shape
    y = y.reshape(B, C, H // 2, 2, W // 2, 2).max(axis=(3, 5))
    y = y.reshape(B, -1)
    return y @ w_fc + b_fc[None, :]


if __name__ == "__main__":
    key = jax.random.PRNGKey(0)
    k_x, k_wc, k_bc, k_wf, k_bf = jax.random.split(key, 5)

    B = 2
    x = jax.random.normal(k_x, (B, C_IN, H_IN, W_IN), dtype=jnp.float32)

    fan_conv = C_IN * KH * KW                    # 147
    fan_fc = C_OUT * PH * PW                     # 5408
    w_conv = jax.random.uniform(k_wc, (C_OUT, C_IN, KH, KW), jnp.float32,
                                -1.0 / fan_conv ** 0.5, 1.0 / fan_conv ** 0.5)
    b_conv = jax.random.uniform(k_bc, (C_OUT,), jnp.float32,
                                -1.0 / fan_conv ** 0.5, 1.0 / fan_conv ** 0.5)
    w_fc = jax.random.uniform(k_wf, (fan_fc, NUM_CLASSES), jnp.float32,
                              -1.0 / fan_fc ** 0.5, 1.0 / fan_fc ** 0.5)
    b_fc = jax.random.uniform(k_bf, (NUM_CLASSES,), jnp.float32,
                              -1.0 / fan_fc ** 0.5, 1.0 / fan_fc ** 0.5)

    fwd = jax.jit(vanilla_cnn_forward)
    out = jax.block_until_ready(fwd(x, w_conv, b_conv, w_fc, b_fc))

    ref = reference_forward(x, w_conv, b_conv, w_fc, b_fc)
    assert out.shape == (B, NUM_CLASSES)
    assert jnp.allclose(out, ref, rtol=1e-2, atol=1e-2), (out, ref)

    print("KERNEL_OK")
</pallas_src>

<mosaic_0001>
module attributes {stable_mosaic.version = 11 : i64} {
  func.func @_fused_cnn_kernel(%arg0: i32, %arg1: memref<1x4x147x176xbf16, #tpu.memory_space<vmem>>, %arg2: memref<32x147xbf16, #tpu.memory_space<vmem>>, %arg3: memref<32x1xf32, #tpu.memory_space<vmem>>, %arg4: memref<10x32x176xf32, #tpu.memory_space<vmem>>, %arg5: memref<176x1xf32, #tpu.memory_space<vmem>>, %arg6: memref<10x1xf32, #tpu.memory_space<vmem>>, %arg7: memref<1x10x1xf32, #tpu.memory_space<vmem>>, %arg8: memref<10x176xf32, #tpu.memory_space<vmem>>) attributes {dimension_semantics = [#tpu.dimension_semantics<parallel>], iteration_bounds = array<i64: 2>, scalar_prefetch = 0 : i64, scratch_operands = 1 : i64, tpu.core_type = #tpu.core_type<tc>, window_params = [{transform_indices = @transform_0, window_bounds = array<i64: 1, 4, 147, 176>}, {pipeline_mode = #tpu.pipeline_mode<synchronous>, transform_indices = @transform_1, window_bounds = array<i64: 32, 147>}, {pipeline_mode = #tpu.pipeline_mode<synchronous>, transform_indices = @transform_2, window_bounds = array<i64: 32, 1>}, {pipeline_mode = #tpu.pipeline_mode<synchronous>, transform_indices = @transform_3, window_bounds = array<i64: 10, 32, 176>}, {pipeline_mode = #tpu.pipeline_mode<synchronous>, transform_indices = @transform_4, window_bounds = array<i64: 176, 1>}, {pipeline_mode = #tpu.pipeline_mode<synchronous>, transform_indices = @transform_5, window_bounds = array<i64: 10, 1>}, {transform_indices = @transform_6, window_bounds = array<i64: 1, 10, 1>}]} {
    %c0 = arith.constant 0 : index
    %c0_0 = arith.constant 0 : index
    %0 = vector.load %arg2[%c0, %c0_0] : memref<32x147xbf16, #tpu.memory_space<vmem>>, vector<32x147xbf16>
    %c0_1 = arith.constant 0 : index
    %c0_2 = arith.constant 0 : index
    %c0_3 = arith.constant 0 : index
    %c0_4 = arith.constant 0 : index
    %1 = vector.load %arg1[%c0_1, %c0_2, %c0_3, %c0_4] : memref<1x4x147x176xbf16, #tpu.memory_space<vmem>>, vector<1x1x147x176xbf16>
    %2 = vector.shape_cast %1 : vector<1x1x147x176xbf16> to vector<147x176xbf16>
    %cst = arith.constant dense<0.000000e+00> : vector<32x176xf32>
    %3 = tpu.matmul %0, %2, %cst {dimension_numbers = #tpu.dot_dimension_numbers<[1], [0], [0], [1], [0, 0, 1, 1], [], []>} : vector<32x147xbf16>, vector<147x176xbf16>, vector<32x176xf32> -> vector<32x176xf32>
    %c0_5 = arith.constant 0 : index
    %c1 = arith.constant 1 : index
    %c0_6 = arith.constant 0 : index
    %c0_7 = arith.constant 0 : index
    %4 = vector.load %arg1[%c0_5, %c1, %c0_6, %c0_7] : memref<1x4x147x176xbf16, #tpu.memory_space<vmem>>, vector<1x1x147x176xbf16>
    %5 = vector.shape_cast %4 : vector<1x1x147x176xbf16> to vector<147x176xbf16>
    %cst_8 = arith.constant dense<0.000000e+00> : vector<32x176xf32>
    %6 = tpu.matmul %0, %5, %cst_8 {dimension_numbers = #tpu.dot_dimension_numbers<[1], [0], [0], [1], [0, 0, 1, 1], [], []>} : vector<32x147xbf16>, vector<147x176xbf16>, vector<32x176xf32> -> vector<32x176xf32>
    %7 = arith.maximumf %3, %6 : vector<32x176xf32>
    %c0_9 = arith.constant 0 : index
    %c2 = arith.constant 2 : index
    %c0_10 = arith.constant 0 : index
    %c0_11 = arith.constant 0 : index
    %8 = vector.load %arg1[%c0_9, %c2, %c0_10, %c0_11] : memref<1x4x147x176xbf16, #tpu.memory_space<vmem>>, vector<1x1x147x176xbf16>
    %9 = vector.shape_cast %8 : vector<1x1x147x176xbf16> to vector<147x176xbf16>
    %cst_12 = arith.constant dense<0.000000e+00> : vector<32x176xf32>
    %10 = tpu.matmul %0, %9, %cst_12 {dimension_numbers = #tpu.dot_dimension_numbers<[1], [0], [0], [1], [0, 0, 1, 1], [], []>} : vector<32x147xbf16>, vector<147x176xbf16>, vector<32x176xf32> -> vector<32x176xf32>
    %11 = arith.maximumf %7, %10 : vector<32x176xf32>
    %c0_13 = arith.constant 0 : index
    %c3 = arith.constant 3 : index
    %c0_14 = arith.constant 0 : index
    %c0_15 = arith.constant 0 : index
    %12 = vector.load %arg1[%c0_13, %c3, %c0_14, %c0_15] : memref<1x4x147x176xbf16, #tpu.memory_space<vmem>>, vector<1x1x147x176xbf16>
    %13 = vector.shape_cast %12 : vector<1x1x147x176xbf16> to vector<147x176xbf16>
    %cst_16 = arith.constant dense<0.000000e+00> : vector<32x176xf32>
    %14 = tpu.matmul %0, %13, %cst_16 {dimension_numbers = #tpu.dot_dimension_numbers<[1], [0], [0], [1], [0, 0, 1, 1], [], []>} : vector<32x147xbf16>, vector<147x176xbf16>, vector<32x176xf32> -> vector<32x176xf32>
    %15 = arith.maximumf %11, %14 : vector<32x176xf32>
    %c0_17 = arith.constant 0 : index
    %c0_18 = arith.constant 0 : index
    %16 = vector.load %arg3[%c0_17, %c0_18] : memref<32x1xf32, #tpu.memory_space<vmem>>, vector<32x1xf32>
    %17 = vector.broadcast %16 : vector<32x1xf32> to vector<32x176xf32>
    %18 = arith.addf %15, %17 : vector<32x176xf32>
    %cst_19 = arith.constant 0.000000e+00 : f32
    %19 = vector.broadcast %cst_19 : f32 to vector<32x176xf32>
    %20 = arith.maximumf %18, %19 : vector<32x176xf32>
    %c0_20 = arith.constant 0 : index
    %c0_21 = arith.constant 0 : index
    %c0_22 = arith.constant 0 : index
    %21 = vector.load %arg4[%c0_20, %c0_21, %c0_22] : memref<10x32x176xf32, #tpu.memory_space<vmem>>, vector<1x32x176xf32>
    %22 = vector.shape_cast %21 : vector<1x32x176xf32> to vector<32x176xf32>
    %23 = arith.mulf %20, %22 : vector<32x176xf32>
    %cst_23 = arith.constant dense<0.000000e+00> : vector<176xf32>
    %24 = vector.multi_reduction <add>, %23, %cst_23 [0] : vector<32x176xf32> to vector<176xf32>
    %25 = vector.shape_cast %24 : vector<176xf32> to vector<1x176xf32>
    %c0_24 = arith.constant 0 : index
    %c0_25 = arith.constant 0 : index
    %26 = vector.load %arg8[%c0_24, %c0_25] : memref<10x176xf32, #tpu.memory_space<vmem>>, vector<1x176xf32>
    tpu.vector_store %arg8[%c0_24, %c0_25], %25 {strides = array<i32>} : memref<10x176xf32, #tpu.memory_space<vmem>>, vector<1x176xf32>,
    %c1_26 = arith.constant 1 : index
    %c0_27 = arith.constant 0 : index
    %c0_28 = arith.constant 0 : index
    %27 = vector.load %arg4[%c1_26, %c0_27, %c0_28] : memref<10x32x176xf32, #tpu.memory_space<vmem>>, vector<1x32x176xf32>
    %28 = vector.shape_cast %27 : vector<1x32x176xf32> to vector<32x176xf32>
    %29 = arith.mulf %20, %28 : vector<32x176xf32>
    %cst_29 = arith.constant dense<0.000000e+00> : vector<176xf32>
    %30 = vector.multi_reduction <add>, %29, %cst_29 [0] : vector<32x176xf32> to vector<176xf32>
    %31 = vector.shape_cast %30 : vector<176xf32> to vector<1x176xf32>
    %c1_30 = arith.constant 1 : index
    %c0_31 = arith.constant 0 : index
    %32 = vector.load %arg8[%c1_30, %c0_31] : memref<10x176xf32, #tpu.memory_space<vmem>>, vector<1x176xf32>
    tpu.vector_store %arg8[%c1_30, %c0_31], %31 {strides = array<i32>} : memref<10x176xf32, #tpu.memory_space<vmem>>, vector<1x176xf32>,
    %c2_32 = arith.constant 2 : index
    %c0_33 = arith.constant 0 : index
    %c0_34 = arith.constant 0 : index
    %33 = vector.load %arg4[%c2_32, %c0_33, %c0_34] : memref<10x32x176xf32, #tpu.memory_space<vmem>>, vector<1x32x176xf32>
    %34 = vector.shape_cast %33 : vector<1x32x176xf32> to vector<32x176xf32>
    %35 = arith.mulf %20, %34 : vector<32x176xf32>
    %cst_35 = arith.constant dense<0.000000e+00> : vector<176xf32>
    %36 = vector.multi_reduction <add>, %35, %cst_35 [0] : vector<32x176xf32> to vector<176xf32>
    %37 = vector.shape_cast %36 : vector<176xf32> to vector<1x176xf32>
    %c2_36 = arith.constant 2 : index
    %c0_37 = arith.constant 0 : index
    %38 = vector.load %arg8[%c2_36, %c0_37] : memref<10x176xf32, #tpu.memory_space<vmem>>, vector<1x176xf32>
    tpu.vector_store %arg8[%c2_36, %c0_37], %37 {strides = array<i32>} : memref<10x176xf32, #tpu.memory_space<vmem>>, vector<1x176xf32>,
    %c3_38 = arith.constant 3 : index
    %c0_39 = arith.constant 0 : index
    %c0_40 = arith.constant 0 : index
    %39 = vector.load %arg4[%c3_38, %c0_39, %c0_40] : memref<10x32x176xf32, #tpu.memory_space<vmem>>, vector<1x32x176xf32>
    %40 = vector.shape_cast %39 : vector<1x32x176xf32> to vector<32x176xf32>
    %41 = arith.mulf %20, %40 : vector<32x176xf32>
    %cst_41 = arith.constant dense<0.000000e+00> : vector<176xf32>
    %42 = vector.multi_reduction <add>, %41, %cst_41 [0] : vector<32x176xf32> to vector<176xf32>
    %43 = vector.shape_cast %42 : vector<176xf32> to vector<1x176xf32>
    %c3_42 = arith.constant 3 : index
    %c0_43 = arith.constant 0 : index
    %44 = vector.load %arg8[%c3_42, %c0_43] : memref<10x176xf32, #tpu.memory_space<vmem>>, vector<1x176xf32>
    tpu.vector_store %arg8[%c3_42, %c0_43], %43 {strides = array<i32>} : memref<10x176xf32, #tpu.memory_space<vmem>>, vector<1x176xf32>,
    %c4 = arith.constant 4 : index
    %c0_44 = arith.constant 0 : index
    %c0_45 = arith.constant 0 : index
    %45 = vector.load %arg4[%c4, %c0_44, %c0_45] : memref<10x32x176xf32, #tpu.memory_space<vmem>>, vector<1x32x176xf32>
    %46 = vector.shape_cast %45 : vector<1x32x176xf32> to vector<32x176xf32>
    %47 = arith.mulf %20, %46 : vector<32x176xf32>
    %cst_46 = arith.constant dense<0.000000e+00> : vector<176xf32>
    %48 = vector.multi_reduction <add>, %47, %cst_46 [0] : vector<32x176xf32> to vector<176xf32>
    %49 = vector.shape_cast %48 : vector<176xf32> to vector<1x176xf32>
    %c4_47 = arith.constant 4 : index
    %c0_48 = arith.constant 0 : index
    %50 = vector.load %arg8[%c4_47, %c0_48] : memref<10x176xf32, #tpu.memory_space<vmem>>, vector<1x176xf32>
    tpu.vector_store %arg8[%c4_47, %c0_48], %49 {strides = array<i32>} : memref<10x176xf32, #tpu.memory_space<vmem>>, vector<1x176xf32>,
    %c5 = arith.constant 5 : index
    %c0_49 = arith.constant 0 : index
    %c0_50 = arith.constant 0 : index
    %51 = vector.load %arg4[%c5, %c0_49, %c0_50] : memref<10x32x176xf32, #tpu.memory_space<vmem>>, vector<1x32x176xf32>
    %52 = vector.shape_cast %51 : vector<1x32x176xf32> to vector<32x176xf32>
    %53 = arith.mulf %20, %52 : vector<32x176xf32>
    %cst_51 = arith.constant dense<0.000000e+00> : vector<176xf32>
    %54 = vector.multi_reduction <add>, %53, %cst_51 [0] : vector<32x176xf32> to vector<176xf32>
    %55 = vector.shape_cast %54 : vector<176xf32> to vector<1x176xf32>
    %c5_52 = arith.constant 5 : index
    %c0_53 = arith.constant 0 : index
    %56 = vector.load %arg8[%c5_52, %c0_53] : memref<10x176xf32, #tpu.memory_space<vmem>>, vector<1x176xf32>
    tpu.vector_store %arg8[%c5_52, %c0_53], %55 {strides = array<i32>} : memref<10x176xf32, #tpu.memory_space<vmem>>, vector<1x176xf32>,
    %c6 = arith.constant 6 : index
    %c0_54 = arith.constant 0 : index
    %c0_55 = arith.constant 0 : index
    %57 = vector.load %arg4[%c6, %c0_54, %c0_55] : memref<10x32x176xf32, #tpu.memory_space<vmem>>, vector<1x32x176xf32>
    %58 = vector.shape_cast %57 : vector<1x32x176xf32> to vector<32x176xf32>
    %59 = arith.mulf %20, %58 : vector<32x176xf32>
    %cst_56 = arith.constant dense<0.000000e+00> : vector<176xf32>
    %60 = vector.multi_reduction <add>, %59, %cst_56 [0] : vector<32x176xf32> to vector<176xf32>
    %61 = vector.shape_cast %60 : vector<176xf32> to vector<1x176xf32>
    %c6_57 = arith.constant 6 : index
    %c0_58 = arith.constant 0 : index
    %62 = vector.load %arg8[%c6_57, %c0_58] : memref<10x176xf32, #tpu.memory_space<vmem>>, vector<1x176xf32>
    tpu.vector_store %arg8[%c6_57, %c0_58], %61 {strides = array<i32>} : memref<10x176xf32, #tpu.memory_space<vmem>>, vector<1x176xf32>,
    %c7 = arith.constant 7 : index
    %c0_59 = arith.constant 0 : index
    %c0_60 = arith.constant 0 : index
    %63 = vector.load %arg4[%c7, %c0_59, %c0_60] : memref<10x32x176xf32, #tpu.memory_space<vmem>>, vector<1x32x176xf32>
    %64 = vector.shape_cast %63 : vector<1x32x176xf32> to vector<32x176xf32>
    %65 = arith.mulf %20, %64 : vector<32x176xf32>
    %cst_61 = arith.constant dense<0.000000e+00> : vector<176xf32>
    %66 = vector.multi_reduction <add>, %65, %cst_61 [0] : vector<32x176xf32> to vector<176xf32>
    %67 = vector.shape_cast %66 : vector<176xf32> to vector<1x176xf32>
    %c7_62 = arith.constant 7 : index
    %c0_63 = arith.constant 0 : index
    %68 = vector.load %arg8[%c7_62, %c0_63] : memref<10x176xf32, #tpu.memory_space<vmem>>, vector<1x176xf32>
    tpu.vector_store %arg8[%c7_62, %c0_63], %67 {strides = array<i32>} : memref<10x176xf32, #tpu.memory_space<vmem>>, vector<1x176xf32>,
    %c8 = arith.constant 8 : index
    %c0_64 = arith.constant 0 : index
    %c0_65 = arith.constant 0 : index
    %69 = vector.load %arg4[%c8, %c0_64, %c0_65] : memref<10x32x176xf32, #tpu.memory_space<vmem>>, vector<1x32x176xf32>
    %70 = vector.shape_cast %69 : vector<1x32x176xf32> to vector<32x176xf32>
    %71 = arith.mulf %20, %70 : vector<32x176xf32>
    %cst_66 = arith.constant dense<0.000000e+00> : vector<176xf32>
    %72 = vector.multi_reduction <add>, %71, %cst_66 [0] : vector<32x176xf32> to vector<176xf32>
    %73 = vector.shape_cast %72 : vector<176xf32> to vector<1x176xf32>
    %c8_67 = arith.constant 8 : index
    %c0_68 = arith.constant 0 : index
    %74 = vector.load %arg8[%c8_67, %c0_68] : memref<10x176xf32, #tpu.memory_space<vmem>>, vector<1x176xf32>
    tpu.vector_store %arg8[%c8_67, %c0_68], %73 {strides = array<i32>} : memref<10x176xf32, #tpu.memory_space<vmem>>, vector<1x176xf32>,
    %c9 = arith.constant 9 : index
    %c0_69 = arith.constant 0 : index
    %c0_70 = arith.constant 0 : index
    %75 = vector.load %arg4[%c9, %c0_69, %c0_70] : memref<10x32x176xf32, #tpu.memory_space<vmem>>, vector<1x32x176xf32>
    %76 = vector.shape_cast %75 : vector<1x32x176xf32> to vector<32x176xf32>
    %77 = arith.mulf %20, %76 : vector<32x176xf32>
    %cst_71 = arith.constant dense<0.000000e+00> : vector<176xf32>
    %78 = vector.multi_reduction <add>, %77, %cst_71 [0] : vector<32x176xf32> to vector<176xf32>
    %79 = vector.shape_cast %78 : vector<176xf32> to vector<1x176xf32>
    %c9_72 = arith.constant 9 : index
    %c0_73 = arith.constant 0 : index
    %80 = vector.load %arg8[%c9_72, %c0_73] : memref<10x176xf32, #tpu.memory_space<vmem>>, vector<1x176xf32>
    tpu.vector_store %arg8[%c9_72, %c0_73], %79 {strides = array<i32>} : memref<10x176xf32, #tpu.memory_space<vmem>>, vector<1x176xf32>,
    %c0_74 = arith.constant 0 : index
    %c0_75 = arith.constant 0 : index
    %81 = vector.load %arg8[%c0_74, %c0_75] : memref<10x176xf32, #tpu.memory_space<vmem>>, vector<10x176xf32>
    %c0_76 = arith.constant 0 : index
    %c0_77 = arith.constant 0 : index
    %82 = vector.load %arg5[%c0_76, %c0_77] : memref<176x1xf32, #tpu.memory_space<vmem>>, vector<176x1xf32>
    %cst_78 = arith.constant dense<0.000000e+00> : vector<10x1xf32>
    %83 = tpu.matmul %81, %82, %cst_78 {dimension_numbers = #tpu.dot_dimension_numbers<[1], [0], [0], [1], [0, 0, 1, 1], [], []>} : vector<10x176xf32>, vector<176x1xf32>, vector<10x1xf32> -> vector<10x1xf32>
    %c0_79 = arith.constant 0 : index
    %c0_80 = arith.constant 0 : index
    %84 = vector.load %arg6[%c0_79, %c0_80] : memref<10x1xf32, #tpu.memory_space<vmem>>, vector<10x1xf32>
    %85 = arith.addf %83, %84 : vector<10x1xf32>
    %c0_81 = arith.constant 0 : index
    %c0_82 = arith.constant 0 : index
    %c0_83 = arith.constant 0 : index
    %86 = vector.load %arg7[%c0_81, %c0_82, %c0_83] : memref<1x10x1xf32, #tpu.memory_space<vmem>>, vector<1x10x1xf32>
    %87 = vector.shape_cast %86 : vector<1x10x1xf32> to vector<10x1xf32>
    %88 = vector.shape_cast %85 : vector<10x1xf32> to vector<1x10x1xf32>
    tpu.vector_store %arg7[%c0_81, %c0_82, %c0_83], %88 {strides = array<i32>} : memref<1x10x1xf32, #tpu.memory_space<vmem>>, vector<1x10x1xf32>,
    return
  }
  func.func @transform_0(%arg0: i32) -> (i32, i32, i32, i32) {
    %c0_i32 = arith.constant 0 : i32
    %c0_i32_0 = arith.constant 0 : i32
    %c0_i32_1 = arith.constant 0 : i32
    %c0_i32_2 = arith.constant 0 : i32
    return %arg0, %c0_i32, %c0_i32_0, %c0_i32_1 : i32, i32, i32, i32
  }
  func.func @transform_1(%arg0: i32) -> (i32, i32) {
    %c0_i32 = arith.constant 0 : i32
    %c0_i32_0 = arith.constant 0 : i32
    %c0_i32_1 = arith.constant 0 : i32
    return %c0_i32, %c0_i32_0 : i32, i32
  }
  func.func @transform_2(%arg0: i32) -> (i32, i32) {
    %c0_i32 = arith.constant 0 : i32
    %c0_i32_0 = arith.constant 0 : i32
    %c0_i32_1 = arith.constant 0 : i32
    return %c0_i32, %c0_i32_0 : i32, i32
  }
  func.func @transform_3(%arg0: i32) -> (i32, i32, i32) {
    %c0_i32 = arith.constant 0 : i32
    %c0_i32_0 = arith.constant 0 : i32
    %c0_i32_1 = arith.constant 0 : i32
    %c0_i32_2 = arith.constant 0 : i32
    return %c0_i32, %c0_i32_0, %c0_i32_1 : i32, i32, i32
  }
  func.func @transform_4(%arg0: i32) -> (i32, i32) {
    %c0_i32 = arith.constant 0 : i32
    %c0_i32_0 = arith.constant 0 : i32
    %c0_i32_1 = arith.constant 0 : i32
    return %c0_i32, %c0_i32_0 : i32, i32
  }
  func.func @transform_5(%arg0: i32) -> (i32, i32) {
    %c0_i32 = arith.constant 0 : i32
    %c0_i32_0 = arith.constant 0 : i32
    %c0_i32_1 = arith.constant 0 : i32
    return %c0_i32, %c0_i32_0 : i32, i32
  }
  func.func @transform_6(%arg0: i32) -> (i32, i32, i32) {
    %c0_i32 = arith.constant 0 : i32
    %c0_i32_0 = arith.constant 0 : i32
    %c0_i32_1 = arith.constant 0 : i32
    return %arg0, %c0_i32, %c0_i32_0 : i32, i32, i32
  }
}

</mosaic_0001>

<bundles_post_ra>
// kernel: vanilla_cnn_forward.1
= control target key start
LH: loop header
LB: loop body
LE: loop exit
PB: predicated region body
PF: predicated region fallthrough
CT: control target
= control target key end

     0   :  { %s2289_s21 = smov 0   ;;  %s3124_s0 = inlined_call_operand.vmem [shape: bf16[2,4,147,176], index: 0, kind: input, shape index: {}]   ;;  %s3125_s1 = inlined_call_operand.vmem [shape: bf16[32,147], index: 1, kind: input, shape index: {}]   ;;  %s3126_s2 = inlined_call_operand.vmem [shape: f32[32,1], index: 2, kind: input, shape index: {}]   ;;  %s3127_s3 = inlined_call_operand.vmem [shape: f32[10,32,176], index: 3, kind: input, shape index: {}]   ;;  %s3128_s4 = inlined_call_operand.vmem [shape: f32[176,1], index: 4, kind: input, shape index: {}]   ;;  %s3129_s5 = inlined_call_operand.vmem [shape: f32[10,1], index: 5, kind: input, shape index: {}]   ;;  %s3130_s6 = inlined_call_operand.vmem [shape: f32[2,10,1], index: 6, kind: output, shape index: {}]  }
   0x1 LB: > { %s1816_s22 = sadd.s32 4294967295, %s2248_s21   ;;  %p1820_p0 = scmp.ge.s32.totalorder %s2248_s21, 1  ;;  %s2248_s21 = sphi %s2289_s21, %s16_s21  }
   0x2   : > { %p212_p1 = scmp.lt.s32.totalorder %s2248_s21, 3 }
   0x4   : > { %p213_p2 = pnand %p1820_p0, %p212_p1 }
   0x6   : > { %216 = sbr.rel (%p213_p2) target bundleno = 646 (0x286), region = 44 }
   0xd   : > { %p242_p3 = scmp.lt.s32.totalorder %s1816_s22, 1  ;;  %v2300_v0 = vld [vmem:[%s3125_s1 + $0x4] ss:$8 sps:$4 sm:$0xff]   ;;  %vm389_vm0 = vcmask 154624   ;;  %v2250_v2 = vmov 0   ;;  %v1007_v3 = vld [vmem:[%s3126_s2 + $0x10] sm:$0xff] }
   0xe   : > { %1848 = vmatprep.mubr.msk.bf16.mxu0 %vm389_vm0, %v2300_v0  ;;  %1889 = vmatprep.mubr.msk.bf16.mxu1 %vm389_vm0, %v2300_v0  ;;  %v1005_v1 = vld [vmem:[%s3126_s2] sm:$0xff]  ;;  %v1006_v4 = vld [vmem:[%s3126_s2 + $0x8] sm:$0xff]  ;;  %v1008_v5 = vld [vmem:[%s3126_s2 + $0x18] sm:$0xff]  ;;  %vm396_vm1 = vcmask 1040384   ;;  %vm397_vm2 = vcmask 1041408   ;;  %v2251_v38 = vmov 65535  }
   0xf   : > { %s3148_s22 = smov (!%p242_p3, %s1816_s22), 1  ;;  %2118 = vset.pattern.permute.xlu0 %v2250_v2  ;;  %2119 = vset.pattern.permute.xlu1 %v2250_v2  ;;  %v398_v39 = vsel %vm396_vm1, 4294967295, %v2251_v38  ;;  %v2375_v57 = vld [vmem:[%s3125_s1] ss:$8 sps:$4 sm:$0xff]   ;;  %v2384_v62 = vld [vmem:[%s3125_s1 + $0x14] ss:$8 sps:$4 sm:$0xff]  }
  0x10   : > { %s2105_s27 = smul.u32 608, %s3148_s22  ;;  %1011 = vperm.xlu0 %2118, %v1005_v1   ;;  %1021 = vperm.xlu1 %2119, %v1007_v3   ;;  %v2362_v46 = vsel %vm397_vm2, %v398_v39, 0  ;;  %vm1070_vm3 = vcmask 392192   ;;  %vm1757_vm5 = vcmask 7168   ;;  %vm1759_vm6 = vcmask 1024  }
  0x12   : > { %s2318_s8 = scalar_lea.vmem %s3124_s0, %s2105_s27  ;;  %s2049_s27 = sshll.u32 %s3148_s22, 4 }
  0x13   : > { %v2120_v6 = vld [vmem:[%s2318_s8 + $0x4] ss:$8 sps:$4 sm:$0xff]   ;;  %v2124_v8 = vld [vmem:[%s2318_s8] ss:$8 sps:$4 sm:$0xff]   ;;  %v2126_v10 = vld [vmem:[%s2318_s8 + $0x14] ss:$8 sps:$4 sm:$0xff]  }
  0x14   : > { %v2122_v7 = vld [vmem:[%s2318_s8 + $0x9c] ss:$8 sps:$4 sm:$0xff]   ;;  %406 = vmatprep.subr.bf16.mxu0 %v2120_v6  ;;  %v2125_v9 = vld [vmem:[%s2318_s8 + $0x98] ss:$8 sps:$4 sm:$0xff]   ;;  %1016 = vperm.xlu0 %2118, %v1006_v4   ;;  %v2128_v11 = vld [vmem:[%s2318_s8 + $0xac] ss:$8 sps:$4 sm:$0xff]  }
  0x15   : > { %580 = vmatprep.subr.bf16.mxu1 %v2122_v7  ;;  %1026 = vperm.xlu1 %2119, %v1008_v5   ;;  %v2130_v12 = vld [vmem:[%s2318_s8 + $0x10] ss:$8 sps:$4 sm:$0xff]   ;;  %v2132_v14 = vld [vmem:[%s2318_s8 + $0x24] ss:$8 sps:$4 sm:$0xff]   ;;  %v2136_v16 = vld [vmem:[%s2318_s8 + $0x20] ss:$8 sps:$4 sm:$0xff]  }
  0x16   : > { %407 = vmatpush1.bf16.msra.mxu0 %v2124_v8  ;;  %581 = vmatpush1.bf16.msra.mxu1 %v2125_v9  ;;  %v2131_v13 = vld [vmem:[%s2318_s8 + $0xa8] ss:$8 sps:$4 sm:$0xff]   ;;  %v2134_v15 = vld [vmem:[%s2318_s8 + $0xbc] ss:$8 sps:$4 sm:$0xff]   ;;  %v2137_v17 = vld [vmem:[%s2318_s8 + $0xb8] ss:$8 sps:$4 sm:$0xff]  }
  0x17   : > { %408 = vmatprep.subr.bf16.mxu0 %v2126_v10  ;;  %582 = vmatprep.subr.bf16.mxu1 %v2128_v11  ;;  %v2138_v18 = vld [vmem:[%s2318_s8 + $0x34] ss:$8 sps:$4 sm:$0xff]   ;;  %v2142_v20 = vld [vmem:[%s2318_s8 + $0x30] ss:$8 sps:$4 sm:$0xff]   ;;  %v2144_v22 = vld [vmem:[%s2318_s8 + $0x44] ss:$8 sps:$4 sm:$0xff]  }
  0x18   : > { %v2140_v19 = vld [vmem:[%s2318_s8 + $0xcc] ss:$8 sps:$4 sm:$0xff]   ;;  %v2143_v21 = vld [vmem:[%s2318_s8 + $0xc8] ss:$8 sps:$4 sm:$0xff]   ;;  %v2146_v23 = vld [vmem:[%s2318_s8 + $0xdc] ss:$8 sps:$4 sm:$0xff]  }
  0x19   : > { %v2148_v24 = vld [vmem:[%s2318_s8 + $0x40] ss:$8 sps:$4 sm:$0xff]   ;;  %v2150_v26 = vld [vmem:[%s2318_s8 + $0x54] ss:$8 sps:$4 sm:$0xff]   ;;  %v2154_v28 = vld [vmem:[%s2318_s8 + $0x50] ss:$8 sps:$4 sm:$0xff]  }
  0x1a   : > { %409 = vmatpush1.bf16.msra.mxu0 %v2130_v12  ;;  %583 = vmatpush1.bf16.msra.mxu1 %v2131_v13  ;;  %v2149_v25 = vld [vmem:[%s2318_s8 + $0xd8] ss:$8 sps:$4 sm:$0xff]   ;;  %v2152_v27 = vld [vmem:[%s2318_s8 + $0xec] ss:$8 sps:$4 sm:$0xff]   ;;  %v2155_v29 = vld [vmem:[%s2318_s8 + $0xe8] ss:$8 sps:$4 sm:$0xff]  }
  0x1b   : > { %410 = vmatprep.subr.bf16.mxu0 %v2132_v14  ;;  %584 = vmatprep.subr.bf16.mxu1 %v2134_v15  ;;  %v2156_v30 = vld [vmem:[%s2318_s8 + $0x64] ss:$8 sps:$4 sm:$0xff]   ;;  %v2160_v32 = vld [vmem:[%s2318_s8 + $0x60] ss:$8 sps:$4 sm:$0xff]   ;;  %v2162_v34 = vld [vmem:[%s2318_s8 + $0x74] ss:$8 sps:$4 sm:$0xff]  }
  0x1c   : > { %v2158_v31 = vld [vmem:[%s2318_s8 + $0xfc] ss:$8 sps:$4 sm:$0xff]   ;;  %v2161_v33 = vld [vmem:[%s2318_s8 + $0xf8] ss:$8 sps:$4 sm:$0xff]   ;;  %v2164_v35 = vld [vmem:[%s2318_s8 + $0x10c] ss:$8 sps:$4 sm:$0xff]  }
  0x1d   : > { %v275_v36 = vld [vmem:[%s2318_s8 + $0x90] sm:$0x33]  ;;  %v1868_v37 = vld [vmem:[%s2318_s8 + $0x128] sm:$0x33]  ;;  %v2170_v43 = vld [vmem:[%s2318_s8 + $0x11c] ss:$8 sps:$4 sm:$0xff]  }
  0x1e   : > { %411 = vmatpush1.bf16.msra.mxu0 %v2136_v16  ;;  %585 = vmatpush1.bf16.msra.mxu1 %v2137_v17  ;;  %v2166_v40 = vld [vmem:[%s2318_s8 + $0x70] ss:$8 sps:$4 sm:$0xff]   ;;  %v2168_v42 = vld [vmem:[%s2318_s8 + $0x84] ss:$8 sps:$4 sm:$0xff]   ;;  %v1847_v44 = vcombine.high %v275_v36, %v275_v36  ;;  %v1888_v45 = vcombine.high %v1868_v37, %v1868_v37  ;;  %v2172_v47 = vld [vmem:[%s2318_s8 + $0x80] ss:$8 sps:$4 sm:$0xff]   ;;  %v1846_v49 = vcombine.low %v275_v36, %v275_v36 }
  0x1f   : > { %412 = vmatprep.subr.bf16.mxu0 %v2138_v18  ;;  %586 = vmatprep.subr.bf16.mxu1 %v2140_v19  ;;  %v2167_v41 = vld [vmem:[%s2318_s8 + $0x108] ss:$8 sps:$4 sm:$0xff]   ;;  %v2173_v48 = vld [vmem:[%s2318_s8 + $0x118] ss:$8 sps:$4 sm:$0xff]   ;;  %v1887_v50 = vcombine.low %v1868_v37, %v1868_v37  ;;  %v2183_v55 = vld [vmem:[%s2318_s8 + $0x134] ss:$8 sps:$4 sm:$0xff]  }
  0x20   : > { %v404_v51 = vand.u32 %v1847_v44, %v2362_v46  ;;  %v578_v52 = vand.u32 %v1888_v45, %v2362_v46  ;;  %v401_v53 = vand.u32 %v1846_v49, %v2362_v46  ;;  %v2186_v56 = vld [vmem:[%s2318_s8 + $0x1cc] ss:$8 sps:$4 sm:$0xff]   ;;  %v2181_v58 = vld [vmem:[%s2318_s8 + $0x130] ss:$8 sps:$4 sm:$0xff]   ;;  %v2192_v61 = vld [vmem:[%s2318_s8 + $0x1dc] ss:$8 sps:$4 sm:$0xff]  }
  0x21   : > { %v575_v54 = vand.u32 %v1887_v50, %v2362_v46  ;;  %v2184_v59 = vld [vmem:[%s2318_s8 + $0x1c8] ss:$8 sps:$4 sm:$0xff]   ;;  %v2189_v60 = vld [vmem:[%s2318_s8 + $0x144] ss:$8 sps:$4 sm:$0xff]   ;;  %v2190_v1 = vld [vmem:[%s2318_s8 + $0x1d8] ss:$8 sps:$4 sm:$0xff]  }
  0x22   : > { %413 = vmatpush1.bf16.msra.mxu0 %v2142_v20  ;;  %587 = vmatpush1.bf16.msra.mxu1 %v2143_v21  ;;  %v2187_v63 = vld [vmem:[%s2318_s8 + $0x140] ss:$8 sps:$4 sm:$0xff]   ;;  %v2195_v2 = vld [vmem:[%s2318_s8 + $0x154] ss:$8 sps:$4 sm:$0xff]   ;;  %v2399_v4 = vld [vmem:[%s3125_s1 + $0x10] ss:$8 sps:$4 sm:$0xff]  }
  0x23   : > { %414 = vmatprep.subr.bf16.mxu0 %v2144_v22  ;;  %588 = vmatprep.subr.bf16.mxu1 %v2146_v23  ;;  %v2198_v3 = vld [vmem:[%s2318_s8 + $0x1ec] ss:$8 sps:$4 sm:$0xff]   ;;  %v2193_v5 = vld [vmem:[%s2318_s8 + $0x150] ss:$8 sps:$4 sm:$0xff]   ;;  %v2204_v8 = vld [vmem:[%s2318_s8 + $0x1fc] ss:$8 sps:$4 sm:$0xff]  }
  0x24   : > { %v2196_v6 = vld [vmem:[%s2318_s8 + $0x1e8] ss:$8 sps:$4 sm:$0xff]   ;;  %v2201_v7 = vld [vmem:[%s2318_s8 + $0x164] ss:$8 sps:$4 sm:$0xff]   ;;  %v2202_v10 = vld [vmem:[%s2318_s8 + $0x1f8] ss:$8 sps:$4 sm:$0xff]  }
  0x25   : > { %v2199_v9 = vld [vmem:[%s2318_s8 + $0x160] ss:$8 sps:$4 sm:$0xff]   ;;  %v2207_v11 = vld [vmem:[%s2318_s8 + $0x174] ss:$8 sps:$4 sm:$0xff]   ;;  %v2205_v13 = vld [vmem:[%s2318_s8 + $0x170] ss:$8 sps:$4 sm:$0xff]  }
  0x26   : > { %415 = vmatpush1.bf16.msra.mxu0 %v2148_v24  ;;  %589 = vmatpush1.bf16.msra.mxu1 %v2149_v25  ;;  %v2210_v12 = vld [vmem:[%s2318_s8 + $0x20c] ss:$8 sps:$4 sm:$0xff]   ;;  %v2208_v14 = vld [vmem:[%s2318_s8 + $0x208] ss:$8 sps:$4 sm:$0xff]   ;;  %v2216_v16 = vld [vmem:[%s2318_s8 + $0x21c] ss:$8 sps:$4 sm:$0xff]  }
  0x27   : > { %416 = vmatprep.subr.bf16.mxu0 %v2150_v26  ;;  %590 = vmatprep.subr.bf16.mxu1 %v2152_v27  ;;  %v2213_v15 = vld [vmem:[%s2318_s8 + $0x184] ss:$8 sps:$4 sm:$0xff]   ;;  %v2211_v17 = vld [vmem:[%s2318_s8 + $0x180] ss:$8 sps:$4 sm:$0xff]   ;;  %v2217_v20 = vld [vmem:[%s2318_s8 + $0x190] ss:$8 sps:$4 sm:$0xff]  }
  0x28   : > { %v2214_v18 = vld [vmem:[%s2318_s8 + $0x218] ss:$8 sps:$4 sm:$0xff]   ;;  %v2222_v19 = vld [vmem:[%s2318_s8 + $0x22c] ss:$8 sps:$4 sm:$0xff]   ;;  %v2220_v21 = vld [vmem:[%s2318_s8 + $0x228] ss:$8 sps:$4 sm:$0xff]  }
  0x29   : > { %v2227_v22 = vld [vmem:[%s2318_s8 + $0x1a4] ss:$8 sps:$4 sm:$0xff]   ;;  %v1950_v25 = vld [vmem:[%s2318_s8 + $0x258] sm:$0x33]  ;;  %v2225_v26 = vld [vmem:[%s2318_s8 + $0x1a0] ss:$8 sps:$4 sm:$0xff]  }
  0x2a   : > { %417 = vmatpush1.bf16.msra.mxu0 %v2154_v28  ;;  %591 = vmatpush1.bf16.msra.mxu1 %v2155_v29  ;;  %v2230_v23 = vld [vmem:[%s2318_s8 + $0x23c] ss:$8 sps:$4 sm:$0xff]   ;;  %v2228_v27 = vld [vmem:[%s2318_s8 + $0x238] ss:$8 sps:$4 sm:$0xff]   ;;  %v2237_v29 = vld [vmem:[%s2318_s8 + $0x24c] ss:$8 sps:$4 sm:$0xff]  }
  0x2b   : > { %418 = vmatprep.subr.bf16.mxu0 %v2156_v30  ;;  %592 = vmatprep.subr.bf16.mxu1 %v2158_v31  ;;  %v1909_v24 = vld [vmem:[%s2318_s8 + $0x1c0] sm:$0x33]  ;;  %v2234_v28 = vld [vmem:[%s2318_s8 + $0x1b4] ss:$8 sps:$4 sm:$0xff]   ;;  %v1970_v31 = vcombine.high %v1950_v25, %v1950_v25 }
  0x2c   : > { %v1929_v30 = vcombine.high %v1909_v24, %v1909_v24  ;;  %v1654_v44 = vld [vmem:[%s3128_s4 + $0x10] sm:$0xff]  ;;  %v1655_v45 = vld [vmem:[%s3128_s4 + $0x18] sm:$0xff] }
  0x2d   : > { %v942_v37 = vand.u32 %v1970_v31, %v2362_v46  ;;  %v1658_v50 = vld [vmem:[%s3128_s4 + $0x30] sm:$0xff] }
  0x2e   : > { %419 = vmatpush1.bf16.msra.mxu0 %v2160_v32  ;;  %593 = vmatpush1.bf16.msra.mxu1 %v2161_v33  ;;  %v2232_v32 = vld [vmem:[%s2318_s8 + $0x1b0] ss:$8 sps:$4 sm:$0xff]   ;;  %v760_v36 = vand.u32 %v1929_v30, %v2362_v46 }
  0x2f   : > { %420 = vmatprep.subr.bf16.mxu0 %v2162_v34  ;;  %594 = vmatprep.subr.bf16.mxu1 %v2164_v35  ;;  %v2235_v33 = vld [vmem:[%s2318_s8 + $0x248] ss:$8 sps:$4 sm:$0xff]   ;;  %v1928_v34 = vcombine.low %v1909_v24, %v1909_v24  ;;  %v1969_v35 = vcombine.low %v1950_v25, %v1950_v25 }
  0x31   : > { %v757_v38 = vand.u32 %v1928_v34, %v2362_v46  ;;  %v939_v39 = vand.u32 %v1969_v35, %v2362_v46  ;;  %v2054_v46 = vpack.c.bf16 %v1655_v45, %v1654_v44 }
  0x32   : > { %421 = vmatpush1.bf16.msra.mxu0 %v2166_v40  ;;  %595 = vmatpush1.bf16.msra.mxu1 %v2167_v41  ;;  %v2252_v40 = vmov 0.0|0.0   ;;  %v1652_v41 = vld [vmem:[%s3128_s4] sm:$0xff] }
  0x33   : > { %422 = vmatprep.subr.bf16.mxu0 %v2168_v42  ;;  %596 = vmatprep.subr.bf16.mxu1 %v2170_v43  ;;  %v1653_v42 = vld [vmem:[%s3128_s4 + $0x8] sm:$0xff] }
  0x34   : > { %v2051_v43 = vpack.c.bf16 %v1653_v42, %v1652_v41 }
  0x36   : > { %423 = vmatpush1.bf16.msra.mxu0 %v2172_v47  ;;  %597 = vmatpush1.bf16.msra.mxu1 %v2173_v48  ;;  %v1656_v47 = vld [vmem:[%s3128_s4 + $0x20] sm:$0xff]  ;;  %v1657_v48 = vld [vmem:[%s3128_s4 + $0x28] sm:$0xff] }
  0x37   : > { %424 = vmatprep.subr.bf16.mxu0 %v404_v51  ;;  %598 = vmatprep.subr.bf16.mxu1 %v578_v52  ;;  %v2057_v49 = vpack.c.bf16 %v1657_v48, %v1656_v47  ;;  %v1659_v51 = vld [vmem:[%s3128_s4 + $0x38] sm:$0xff] }
  0x38   : > { %v2060_v52 = vpack.c.bf16 %v1659_v51, %v1658_v50 }
  0x3a   : > { %425 = vmatpush1.bf16.msra.mxu0 %v401_v53  ;;  %599 = vmatpush1.bf16.msra.mxu1 %v575_v54  ;;  %v1660_v53 = vld [vmem:[%s3128_s4 + $0x40] sm:$0xff]  ;;  %v1661_v54 = vld [vmem:[%s3128_s4 + $0x48] sm:$0xff] }
  0x3b   : > { %762 = vmatprep.subr.bf16.mxu0 %v2183_v55  ;;  %944 = vmatprep.subr.bf16.mxu1 %v2186_v56  ;;  %v2063_v55 = vpack.c.bf16 %v1661_v54, %v1660_v53  ;;  %v1662_v56 = vld [vmem:[%s3128_s4 + $0x50] sm:$0xff]  ;;  %v1045_v54 = vld [vmem:[%s3127_s3] sm:$0xff] }
  0x3d   : > { %439 = vmatmul.mubr.bf16.vlgmr.msra.gmra.mrb[0].mxu0 %v2375_v57  ;;  %613 = vmatmul.mubr.bf16.vlgmr.msra.gmra.mrb[0].mxu1 %v2375_v57 }
  0x3e   : > { %763 = vmatpush1.bf16.msra.mxu0 %v2181_v58  ;;  %945 = vmatpush1.bf16.msra.mxu1 %v2184_v59  ;;  %v1664_v59 = vld [vmem:[%s3128_s4 + $0x60] sm:$0xff] }
  0x3f   : > { %764 = vmatprep.subr.bf16.mxu0 %v2189_v60  ;;  %946 = vmatprep.subr.bf16.mxu1 %v2192_v61  ;;  %v1665_v60 = vld [vmem:[%s3128_s4 + $0x68] sm:$0xff] }
  0x40   : > { %1849 = vmatprep.mubr.msk.bf16.mxu0 %vm389_vm0, %v2384_v62  ;;  %1890 = vmatprep.mubr.msk.bf16.mxu1 %vm389_vm0, %v2384_v62  ;;  %v2069_v61 = vpack.c.bf16 %v1665_v60, %v1664_v59  ;;  %v1973_v59 = vld [vmem:[%s3127_s3 + $0x40] sm:$0xff]  ;;  %v1974_v60 = vld [vmem:[%s3127_s3 + $0x48] sm:$0xff] }
  0x42   : > { %765 = vmatpush1.bf16.msra.mxu0 %v2187_v63  ;;  %947 = vmatpush1.bf16.msra.mxu1 %v2190_v1  ;;  %v1667_v63 = vld [vmem:[%s3128_s4 + $0x78] sm:$0xff] }
  0x43   : > { %766 = vmatprep.subr.bf16.mxu0 %v2195_v2  ;;  %948 = vmatprep.subr.bf16.mxu1 %v2198_v3  ;;  %v1668_v2 = vld [vmem:[%s3128_s4 + $0x80] sm:$0xff]  ;;  %v1669_v3 = vld [vmem:[%s3128_s4 + $0x88] sm:$0xff] }
  0x45   : > { %449 = vmatmul.mubr.bf16.gmra.mrb[4].mxu0 %v2399_v4  ;;  %623 = vmatmul.mubr.bf16.gmra.mrb[4].mxu1 %v2399_v4 }
  0x46   : > { %767 = vmatpush1.bf16.msra.mxu0 %v2193_v5  ;;  %949 = vmatpush1.bf16.msra.mxu1 %v2196_v6  ;;  %v1670_v5 = vld [vmem:[%s3128_s4 + $0x90] sm:$0xff]  ;;  %v1671_v6 = vld [vmem:[%s3128_s4 + $0x98] sm:$0xff] }
  0x47   : > { %768 = vmatprep.subr.bf16.mxu0 %v2201_v7  ;;  %950 = vmatprep.subr.bf16.mxu1 %v2204_v8  ;;  %v2078_v7 = vpack.c.bf16 %v1671_v6, %v1670_v5  ;;  %v1672_v8 = vld [vmem:[%s3128_s4 + $0xa0] sm:$0xff]  ;;  %v1998_v6 = vld [vmem:[%s3127_s3 + $0x108] sm:$0xff] }
  0x48   : > { %1930 = vmatprep.mubr.msk.bf16.mxu0 %vm389_vm0, %v2300_v0  ;;  %1971 = vmatprep.mubr.msk.bf16.mxu1 %vm389_vm0, %v2300_v0  ;;  %v2219_v0 = vld [vmem:[%s2318_s8 + $0x194] ss:$8 sps:$4 sm:$0xff]   ;;  %v1997_v5 = vld [vmem:[%s3127_s3 + $0x100] sm:$0xff]  ;;  %s251_s8 = scalar_lea.vmem %s3130_s6, %s2049_s27 }
  0x4a   : > { %769 = vmatpush1.bf16.msra.mxu0 %v2199_v9  ;;  %951 = vmatpush1.bf16.msra.mxu1 %v2202_v10  ;;  %v1673_v9 = vld [vmem:[%s3128_s4 + $0xa8] sm:$0xff] }
  0x4b   : > { %770 = vmatprep.subr.bf16.mxu0 %v2207_v11  ;;  %952 = vmatprep.subr.bf16.mxu1 %v2210_v12  ;;  %v2081_v10 = vpack.c.bf16 %v1673_v9, %v1672_v8 }
  0x4e   : > { %771 = vmatpush1.bf16.msra.mxu0 %v2205_v13  ;;  %953 = vmatpush1.bf16.msra.mxu1 %v2208_v14 }
  0x4f   : > { %772 = vmatprep.subr.bf16.mxu0 %v2213_v15  ;;  %954 = vmatprep.subr.bf16.mxu1 %v2216_v16 }
  0x52   : > { %773 = vmatpush1.bf16.msra.mxu0 %v2211_v17  ;;  %955 = vmatpush1.bf16.msra.mxu1 %v2214_v18 }
  0x53   : > { %774 = vmatprep.subr.bf16.mxu0 %v2219_v0  ;;  %956 = vmatprep.subr.bf16.mxu1 %v2222_v19 }
  0x56   : > { %775 = vmatpush1.bf16.msra.mxu0 %v2217_v20  ;;  %957 = vmatpush1.bf16.msra.mxu1 %v2220_v21 }
  0x57   : > { %776 = vmatprep.subr.bf16.mxu0 %v2227_v22  ;;  %958 = vmatprep.subr.bf16.mxu1 %v2230_v23 }
  0x5a   : > { %777 = vmatpush1.bf16.msra.mxu0 %v2225_v26  ;;  %959 = vmatpush1.bf16.msra.mxu1 %v2228_v27 }
  0x5b   : > { %778 = vmatprep.subr.bf16.mxu0 %v2234_v28  ;;  %960 = vmatprep.subr.bf16.mxu1 %v2237_v29 }
  0x5e   : > { %779 = vmatpush1.bf16.msra.mxu0 %v2232_v32  ;;  %961 = vmatpush1.bf16.msra.mxu1 %v2235_v33  ;;  %v2040_v33 = vld [vmem:[%s3127_s3 + $0x258] sm:$0xff] }
  0x5f   : > { %780 = vmatprep.subr.bf16.mxu0 %v760_v36  ;;  %962 = vmatprep.subr.bf16.mxu1 %v942_v37  ;;  %v2253_v37 = vmov 1966171168  }
  0x62   : > { %781 = vmatpush1.bf16.msra.mxu0 %v757_v38  ;;  %963 = vmatpush1.bf16.msra.mxu1 %v939_v39  ;;  %v1088_v38 = vunpack.c.l.s4 %v2253_v37  ;;  %v3131_v39 = vlaneseq }
  0x63   : > { %2050 = vmatprep.subr.bf16.mxu0 %v2252_v40  ;;  %2083 = vmatprep.subr.bf16.mxu1 %v2252_v40 }
  0x64   : > { %v1091_v53 = vshrl.u32 %v3131_v39, 7 }
  0x65   : > { %795 = vmatmul.mubr.bf16.vlgmr.msra.gmra.mrb[8].mxu0 %v2375_v57  ;;  %977 = vmatmul.mubr.bf16.vlgmr.msra.gmra.mrb[8].mxu1 %v2375_v57  ;;  %v1663_v57 = vld [vmem:[%s3128_s4 + $0x58] sm:$0xff] }
  0x66   : > { %1931 = vmatprep.mubr.msk.bf16.mxu0 %vm389_vm0, %v2384_v62  ;;  %1972 = vmatprep.mubr.msk.bf16.mxu1 %vm389_vm0, %v2384_v62  ;;  %v2066_v58 = vpack.c.bf16 %v1663_v57, %v1662_v56  ;;  %v1666_v62 = vld [vmem:[%s3128_s4 + $0x70] sm:$0xff] }
  0x67   : > { %2052 = vmatpush1.bf16.msra.mxu0 %v2051_v43  ;;  %2094 = vmatpush1.bf16.msra.mxu1 %v2051_v43  ;;  %v2072_v1 = vpack.c.bf16 %v1667_v63, %v1666_v62 }
  0x68   : > { %2053 = vmatprep.subr.bf16.mxu0 %v2252_v40  ;;  %2084 = vmatprep.subr.bf16.mxu1 %v2252_v40 }
  0x6b   : > { %2055 = vmatpush1.bf16.msra.mxu0 %v2054_v46  ;;  %2095 = vmatpush1.bf16.msra.mxu1 %v2054_v46 }
  0x6c   : > { %2056 = vmatprep.subr.bf16.mxu0 %v2252_v40  ;;  %2085 = vmatprep.subr.bf16.mxu1 %v2252_v40 }
  0x6d   : > { %805 = vmatmul.mubr.bf16.gmra.mrb[12].mxu0 %v2399_v4  ;;  %987 = vmatmul.mubr.bf16.gmra.mrb[12].mxu1 %v2399_v4  ;;  %v2075_v4 = vpack.c.bf16 %v1669_v3, %v1668_v2  ;;  %v1989_v2 = vld [vmem:[%s3127_s3 + $0xc0] sm:$0xff]  ;;  %v1990_v3 = vld [vmem:[%s3127_s3 + $0xc8] sm:$0xff] }
  0x6f   : > { %2058 = vmatpush1.bf16.msra.mxu0 %v2057_v49  ;;  %2096 = vmatpush1.bf16.msra.mxu1 %v2057_v49 }
  0x70   : > { %2059 = vmatprep.subr.bf16.mxu0 %v2252_v40  ;;  %2086 = vmatprep.subr.bf16.mxu1 %v2252_v40 }
  0x73   : > { %2061 = vmatpush1.bf16.msra.mxu0 %v2060_v52  ;;  %2097 = vmatpush1.bf16.msra.mxu1 %v2060_v52  ;;  %v1089_v52 = vunpack.c.0.s8 %v1088_v38 }
  0x74   : > { %2062 = vmatprep.subr.bf16.mxu0 %v2252_v40  ;;  %2087 = vmatprep.subr.bf16.mxu1 %v2252_v40 }
  0x77   : > { %2064 = vmatpush1.bf16.msra.mxu0 %v2063_v55  ;;  %2098 = vmatpush1.bf16.msra.mxu1 %v2063_v55  ;;  %v1046_v55 = vld [vmem:[%s3127_s3 + $0x8] sm:$0xff] }
  0x78   : > { %2065 = vmatprep.subr.bf16.mxu0 %v2252_v40  ;;  %2088 = vmatprep.subr.bf16.mxu1 %v2252_v40 }
  0x7b   : > { %2067 = vmatpush1.bf16.msra.mxu0 %v2066_v58  ;;  %2099 = vmatpush1.bf16.msra.mxu1 %v2066_v58 }
  0x7c   : > { %2068 = vmatprep.subr.bf16.mxu0 %v2252_v40  ;;  %2089 = vmatprep.subr.bf16.mxu1 %v2252_v40 }
  0x7f   : > { %2070 = vmatpush1.bf16.msra.mxu0 %v2069_v61  ;;  %2100 = vmatpush1.bf16.msra.mxu1 %v2069_v61  ;;  %v1981_v61 = vld [vmem:[%s3127_s3 + $0x80] sm:$0xff] }
  0x80   : > { %2071 = vmatprep.subr.bf16.mxu0 %v2252_v40  ;;  %2090 = vmatprep.subr.bf16.mxu1 %v2252_v40 }
  0x83   : > { %2073 = vmatpush1.bf16.msra.mxu0 %v2072_v1  ;;  %2101 = vmatpush1.bf16.msra.mxu1 %v2072_v1  ;;  %v1982_v1 = vld [vmem:[%s3127_s3 + $0x88] sm:$0xff] }
  0x84   : > { %2074 = vmatprep.subr.bf16.mxu0 %v2252_v40  ;;  %2091 = vmatprep.subr.bf16.mxu1 %v2252_v40 }
  0x87   : > { %2076 = vmatpush1.bf16.msra.mxu0 %v2075_v4  ;;  %2102 = vmatpush1.bf16.msra.mxu1 %v2075_v4 }
  0x88   : > { %2077 = vmatprep.subr.bf16.mxu0 %v2252_v40  ;;  %2092 = vmatprep.subr.bf16.mxu1 %v2252_v40 }
  0x8b   : > { %2079 = vmatpush1.bf16.msra.mxu0 %v2078_v7  ;;  %2103 = vmatpush1.bf16.msra.mxu1 %v2078_v7  ;;  %v2006_v7 = vld [vmem:[%s3127_s3 + $0x148] sm:$0xff] }
  0x8c   : > { %2080 = vmatprep.subr.bf16.mxu0 %v2252_v40  ;;  %2093 = vmatprep.subr.bf16.mxu1 %v2252_v40 }
  0x8f   : > { %2082 = vmatpush1.bf16.msra.mxu0 %v2081_v10  ;;  %2104 = vmatpush1.bf16.msra.mxu1 %v2081_v10  ;;  %v1012_v34 = vpop.permute.xlu0 %1011  ;;  %v1022_v39 = vpop.permute.xlu1 %1021 }
  0x93   : > { %v1017_v58 = vpop.permute.xlu0 %1016 }
 0x110   : > { %v440_v11 = vpop.f32.mrb[0].mxu0  ;;  %v614_v12 = vpop.f32.mrb[0].mxu1 }
 0x111   : > { %v633_v13 = vmax.f32 %v440_v11, %v614_v12  ;;  %v442_v14 = vpop.f32.mrb[1].mxu0  ;;  %v616_v15 = vpop.f32.mrb[1].mxu1  ;;  %v2595_v12 = vsub.s32 %v1089_v52, %v1091_v53 }
 0x112   : > { %v634_v16 = vmax.f32 %v442_v14, %v616_v15  ;;  %v444_v17 = vpop.f32.mrb[2].mxu0  ;;  %v618_v18 = vpop.f32.mrb[2].mxu1 }
 0x113   : > { %v635_v0 = vmax.f32 %v444_v17, %v618_v18  ;;  %v446_v19 = vpop.f32.mrb[3].mxu0  ;;  %v620_v20 = vpop.f32.mrb[3].mxu1 }
 0x114   : > { %v636_v21 = vmax.f32 %v446_v19, %v620_v20  ;;  %v2013_v19 = vld [vmem:[%s3127_s3 + $0x180] sm:$0xff]  ;;  %v2014_v20 = vld [vmem:[%s3127_s3 + $0x188] sm:$0xff] }
 0x118   : > { %v2535_v22 = vpop.f32.mrb[4].mxu0  ;;  %v2537_v23 = vpop.f32.mrb[4].mxu1 }
 0x119   : > { %v637_v24 = vmax.f32 %v2535_v22, %v2537_v23  ;;  %v2541_v25 = vpop.f32.mrb[5].mxu0  ;;  %v2543_v26 = vpop.f32.mrb[5].mxu1  ;;  %v2008_v22 = vld [vmem:[%s3127_s3 + $0x158] sm:$0xff] }
 0x11a   : > { %v638_v27 = vmax.f32 %v2541_v25, %v2543_v26  ;;  %v2547_v28 = vpop.f32.mrb[6].mxu0  ;;  %v2549_v29 = vpop.f32.mrb[6].mxu1 }
 0x11b   : > { %v2553_v31 = vpop.f32.mrb[7].mxu0  ;;  %v2555_v32 = vpop.f32.mrb[7].mxu1 }
 0x138   : > { %v796_v35 = vpop.f32.mrb[8].mxu0  ;;  %v978_v36 = vpop.f32.mrb[8].mxu1 }
 0x139   : > { %v815_v40 = vmax.f32 %v633_v13, %v796_v35  ;;  %v798_v41 = vpop.f32.mrb[9].mxu0  ;;  %v980_v42 = vpop.f32.mrb[9].mxu1  ;;  %v2005_v13 = vld [vmem:[%s3127_s3 + $0x140] sm:$0xff] }
 0x13a   : > { %v816_v43 = vmax.f32 %v634_v16, %v798_v41  ;;  %v800_v44 = vpop.f32.mrb[10].mxu0  ;;  %v982_v45 = vpop.f32.mrb[10].mxu1  ;;  %v2022_v41 = vld [vmem:[%s3127_s3 + $0x1c8] sm:$0xff] }
 0x13b   : > { %v997_v46 = vmax.f32 %v815_v40, %v978_v36  ;;  %v817_v47 = vmax.f32 %v635_v0, %v800_v44  ;;  %v802_v48 = vpop.f32.mrb[11].mxu0  ;;  %v984_v49 = vpop.f32.mrb[11].mxu1  ;;  %v2021_v40 = vld [vmem:[%s3127_s3 + $0x1c0] sm:$0xff] }
 0x13c   : > { %v998_v50 = vmax.f32 %v816_v43, %v980_v42  ;;  %v818_v51 = vmax.f32 %v636_v21, %v802_v48  ;;  %v2030_v42 = vld [vmem:[%s3127_s3 + $0x208] sm:$0xff] }
 0x13d   : > { %v1029_v56 = vadd.f32 %v1012_v34, %v997_v46  ;;  %v999_v57 = vmax.f32 %v817_v47, %v982_v45 }
 0x13e   : > { %v1030_v62 = vadd.f32 %v1012_v34, %v998_v50  ;;  %v1000_v63 = vmax.f32 %v818_v51, %v984_v49  ;;  %v2029_v49 = vld [vmem:[%s3127_s3 + $0x200] sm:$0xff] }
 0x13f   : > { %v1037_v4 = vmax.f32 %v1029_v56, 0.0  ;;  %v1031_v9 = vadd.f32 %v1017_v58, %v999_v57  ;;  %v2037_v50 = vld [vmem:[%s3127_s3 + $0x240] sm:$0xff] }
 0x140   : > { %v1038_v8 = vmax.f32 %v1030_v62, 0.0  ;;  %v806_v10 = vpop.f32.mrb[12].mxu0  ;;  %v2593_v11 = vpop.f32.mrb[12].mxu1  ;;  %v1032_v17 = vadd.f32 %v1017_v58, %v1000_v63 }
 0x141   : > { %v2600_v14 = vmul.f32 %v1045_v54, %v1037_v4  ;;  %v2602_v15 = vmul.f32 %v1973_v59, %v1037_v4  ;;  %v2604_v16 = vmul.f32 %v1981_v61, %v1037_v4  ;;  %v2606_v18 = vpop.f32.mrb[13].mxu0  ;;  %v2608_v0 = vpop.f32.mrb[13].mxu1  ;;  %v1237_v43 = vmul.f32 %v1989_v2, %v1037_v4  ;;  %v1048_v2 = vld [vmem:[%s3127_s3 + $0x18] sm:$0xff] }
 0x142   : > { %v1054_v21 = vmul.f32 %v1046_v55, %v1038_v8  ;;  %v1118_v34 = vmul.f32 %v1974_v60, %v1038_v8  ;;  %v1178_v35 = vmul.f32 %v1982_v1, %v1038_v8  ;;  %v1238_v36 = vmul.f32 %v1990_v3, %v1038_v8  ;;  %v2616_v37 = vpop.f32.mrb[14].mxu0  ;;  %v2618_v38 = vpop.f32.mrb[14].mxu1  ;;  %v2038_v55 = vld [vmem:[%s3127_s3 + $0x248] sm:$0xff]  ;;  %v1047_v60 = vld [vmem:[%s3127_s3 + $0x10] sm:$0xff] }
 0x143   : > { %v2629_v44 = vmul.f32 %v1997_v5, %v1037_v4  ;;  %v1298_v45 = vmul.f32 %v1998_v6, %v1038_v8  ;;  %v1358_v46 = vmul.f32 %v2006_v7, %v1038_v8  ;;  %v2631_v47 = vpop.f32.mrb[15].mxu0  ;;  %v2633_v48 = vpop.f32.mrb[15].mxu1  ;;  %v2650_v54 = vmul.f32 %v2005_v13, %v1037_v4  ;;  %v1975_v3 = vld [vmem:[%s3127_s3 + $0x50] sm:$0xff] }
 0x144   : > { %v2642_v51 = vsel %vm1070_vm3, %v1054_v21, 0.0  ;;  %v2645_v52 = vsel %vm1070_vm3, %v1118_v34, 0.0  ;;  %v2648_v53 = vsel %vm1070_vm3, %v1178_v35, 0.0  ;;  %v2656_v56 = vsel %vm1070_vm3, %v1238_v36, 0.0  ;;  %v1983_v5 = vld [vmem:[%s3127_s3 + $0x90] sm:$0xff] }
 0x145   : > { %v2659_v57 = vsel %vm1070_vm3, %v1298_v45, 0.0  ;;  %v2662_v58 = vsel %vm1070_vm3, %v1358_v46, 0.0  ;;  %v1418_v59 = vmul.f32 %v2014_v20, %v1038_v8  ;;  %v1417_v61 = vmul.f32 %v2013_v19, %v1037_v4  ;;  %v1976_v19 = vld [vmem:[%s3127_s3 + $0x58] sm:$0xff]  ;;  %v1991_v21 = vld [vmem:[%s3127_s3 + $0xd0] sm:$0xff] }
 0x146   : > { %v1477_v62 = vmul.f32 %v2021_v40, %v1037_v4  ;;  %v1478_v63 = vmul.f32 %v2022_v41, %v1038_v8  ;;  %v1538_v1 = vmul.f32 %v2030_v42, %v1038_v8  ;;  %v2679_v7 = vmul.f32 %v2029_v49, %v1037_v4  ;;  %v1984_v20 = vld [vmem:[%s3127_s3 + $0x98] sm:$0xff] }
 0x147   : > { %v2677_v6 = vsel %vm1070_vm3, %v1418_v59, 0.0  ;;  %v2681_v13 = vmul.f32 %v2037_v50, %v1037_v4  ;;  %v1039_v34 = vmax.f32 %v1031_v9, 0.0  ;;  %v1598_v36 = vmul.f32 %v2038_v55, %v1038_v8  ;;  %v1992_v4 = vld [vmem:[%s3127_s3 + $0xd8] sm:$0xff]  ;;  %v1999_v9 = vld [vmem:[%s3127_s3 + $0x110] sm:$0xff] }
 0x148   : > { %v2693_v35 = vsel %vm1070_vm3, %v1478_v63, 0.0  ;;  %v1040_v40 = vmax.f32 %v1032_v17, 0.0  ;;  %v819_v41 = vmax.f32 %v637_v24, %v806_v10  ;;  %v2702_v42 = vsel %vm1070_vm3, %v1538_v1, 0.0  ;;  %v2000_v8 = vld [vmem:[%s3127_s3 + $0x118] sm:$0xff]  ;;  %v2007_v17 = vld [vmem:[%s3127_s3 + $0x150] sm:$0xff] }
 0x149   : > { %v1055_v45 = vmul.f32 %v1047_v60, %v1039_v34  ;;  %v1119_v46 = vmul.f32 %v1975_v3, %v1039_v34  ;;  %v1179_v49 = vmul.f32 %v1983_v5, %v1039_v34  ;;  %v1239_v50 = vmul.f32 %v1991_v21, %v1039_v34  ;;  %v2015_v55 = vld [vmem:[%s3127_s3 + $0x190] sm:$0xff]  ;;  %v2016_v59 = vld [vmem:[%s3127_s3 + $0x198] sm:$0xff] }
 0x14a   : > { %v1056_v23 = vmul.f32 %v1048_v2, %v1040_v40  ;;  %v1120_v24 = vmul.f32 %v1976_v19, %v1040_v40  ;;  %v1180_v10 = vmul.f32 %v1984_v20, %v1040_v40  ;;  %v2023_v60 = vld [vmem:[%s3127_s3 + $0x1d0] sm:$0xff]  ;;  %v1240_v3 = vmul.f32 %v1992_v4, %v1040_v40  ;;  %v2024_v19 = vld [vmem:[%s3127_s3 + $0x1d8] sm:$0xff] }
 0x14b   : > { %v2726_v63 = vadd.f32 %v1055_v45, %v2600_v14  ;;  %v2729_v1 = vadd.f32 %v1119_v46, %v2602_v15  ;;  %v2732_v2 = vadd.f32 %v1179_v49, %v2604_v16  ;;  %v2735_v5 = vsel %vm1070_vm3, %v1598_v36, 0.0  ;;  %v2031_v36 = vld [vmem:[%s3127_s3 + $0x210] sm:$0xff]  ;;  %v2032_v4 = vld [vmem:[%s3127_s3 + $0x218] sm:$0xff] }
 0x14c   : > { %3132 = vst [vmem:[#allocation3_spill] sm:$0xff] %v2735_v5  ;;  %v1072_v20 = vsel %vm1070_vm3, %v1056_v23, 0.0  ;;  %v1135_v21 = vsel %vm1070_vm3, %v1120_v24, 0.0  ;;  %v2742_v14 = vadd.f32 %v1239_v50, %v1237_v43  ;;  %v1195_v15 = vsel %vm1070_vm3, %v1180_v10, 0.0  ;;  %v2039_v49 = vld [vmem:[%s3127_s3 + $0x250] sm:$0xff] }
 0x14d   : > { %v1299_v45 = vmul.f32 %v1999_v9, %v1039_v34  ;;  %v1300_v46 = vmul.f32 %v2000_v8, %v1040_v40  ;;  %v1359_v16 = vmul.f32 %v2007_v17, %v1039_v34  ;;  %v1360_v23 = vmul.f32 %v2008_v22, %v1040_v40 }
 0x14e   : > { %v1419_v43 = vmul.f32 %v2015_v55, %v1039_v34  ;;  %v1420_v24 = vmul.f32 %v2016_v59, %v1040_v40  ;;  %v1479_v50 = vmul.f32 %v2023_v60, %v1039_v34  ;;  %v1255_v9 = vsel %vm1070_vm3, %v1240_v3, 0.0 }
 0x14f   : > { %v2756_v8 = vadd.f32 %v1299_v45, %v2629_v44  ;;  %v2759_v17 = vadd.f32 %v1359_v16, %v2650_v54  ;;  %v1480_v10 = vmul.f32 %v2024_v19, %v1040_v40  ;;  %v1315_v30 = vsel %vm1070_vm3, %v1300_v46, 0.0 }
 0x150   : > { %v1375_v22 = vsel %vm1070_vm3, %v1360_v23, 0.0  ;;  %v2766_v55 = vadd.f32 %v1419_v43, %v1417_v61  ;;  %v2768_v59 = vadd.f32 %v1479_v50, %v1477_v62  ;;  %v1435_v44 = vsel %vm1070_vm3, %v1420_v24, 0.0 }
 0x151   : > { %v1539_v60 = vmul.f32 %v2031_v36, %v1039_v34  ;;  %v1540_v3 = vmul.f32 %v2032_v4, %v1040_v40  ;;  %v1599_v54 = vmul.f32 %v2039_v49, %v1039_v34  ;;  %v2772_v19 = vsel %vm1070_vm3, %v1480_v10, 0.0  ;;  %v2017_v4 = vld [vmem:[%s3127_s3 + $0x1a0] sm:$0xff]  ;;  %v1050_v49 = vld [vmem:[%s3127_s3 + $0x28] sm:$0xff] }
 0x152   : > { %v1001_v45 = vmax.f32 %v819_v41, %v2593_v11  ;;  %v820_v46 = vmax.f32 %v638_v27, %v2606_v18  ;;  %v3133_v61 = vmax.f32 %v2547_v28, %v2549_v29  ;;  %v1600_v36 = vmul.f32 %v2040_v33, %v1040_v40  ;;  %v1049_v27 = vld [vmem:[%s3127_s3 + $0x20] sm:$0xff]  ;;  %v1986_v10 = vld [vmem:[%s3127_s3 + $0xa8] sm:$0xff] }
 0x153   : > { %v2784_v16 = vadd.f32 %v1539_v60, %v2679_v7  ;;  %v2787_v34 = vadd.f32 %v1599_v54, %v2681_v13  ;;  %v3135_v11 = vmax.f32 %v2553_v31, %v2555_v32  ;;  %v2794_v25 = vsel %vm1070_vm3, %v1540_v3, 0.0  ;;  %v1977_v28 = vld [vmem:[%s3127_s3 + $0x60] sm:$0xff]  ;;  %v2002_v60 = vld [vmem:[%s3127_s3 + $0x128] sm:$0xff] }
 0x154   : > { %v821_v62 = vmax.f32 %v3133_v61, %v2616_v37  ;;  %v1033_v26 = vadd.f32 %v1022_v39, %v1001_v45  ;;  %v1002_v29 = vmax.f32 %v820_v46, %v2608_v0  ;;  %v1985_v31 = vld [vmem:[%s3127_s3 + $0xa0] sm:$0xff]  ;;  %v1027_v37 = vpop.permute.xlu1 %1026  ;;  %v2815_v7 = vadd.f32 %v1072_v20, %v2642_v51  ;;  %v2010_v3 = vld [vmem:[%s3127_s3 + $0x168] sm:$0xff] }
 0x155   : > { %3134 = vst [vmem:[#allocation4_spill] sm:$0xff] %v2787_v34  ;;  %v822_v41 = vmax.f32 %v3135_v11, %v2631_v47  ;;  %v1993_v32 = vld [vmem:[%s3127_s3 + $0xe0] sm:$0xff]  ;;  %v2818_v0 = vadd.f32 %v1135_v21, %v2645_v52  ;;  %v2833_v52 = vadd.f32 %v1255_v9, %v2656_v56  ;;  %v2851_v56 = vadd.f32 %v1375_v22, %v2662_v58  ;;  %v1978_v9 = vld [vmem:[%s3127_s3 + $0x68] sm:$0xff] }
 0x156   : > { %v1003_v33 = vmax.f32 %v821_v62, %v2618_v38  ;;  %v2001_v18 = vld [vmem:[%s3127_s3 + $0x120] sm:$0xff]  ;;  %v2821_v38 = vadd.f32 %v1195_v15, %v2648_v53  ;;  %v1041_v13 = vmax.f32 %v1033_v26, 0.0  ;;  %v1034_v51 = vadd.f32 %v1022_v39, %v1002_v29  ;;  %v2018_v54 = vld [vmem:[%s3127_s3 + $0x1a8] sm:$0xff]  ;;  %v1987_v29 = vld [vmem:[%s3127_s3 + $0xb0] sm:$0xff] }
 0x157   : > { %v1004_v47 = vmax.f32 %v822_v41, %v2633_v48  ;;  %v2009_v40 = vld [vmem:[%s3127_s3 + $0x160] sm:$0xff]  ;;  %v2836_v53 = vsel %vm1070_vm3, %v1600_v36, 0.0  ;;  %v2848_v39 = vadd.f32 %v1315_v30, %v2659_v57  ;;  %v2854_v23 = vadd.f32 %v1435_v44, %v2677_v6  ;;  %v1994_v30 = vld [vmem:[%s3127_s3 + $0xe8] sm:$0xff] }
 0x158   : > { %v2025_v48 = vld [vmem:[%s3127_s3 + $0x1e0] sm:$0xff]  ;;  %v1035_v20 = vadd.f32 %v1027_v37, %v1003_v33  ;;  %3136 = vst [vmem:[#allocation5_spill] sm:$0xff] %v2836_v53  ;;  %v1057_v43 = vmul.f32 %v1049_v27, %v1041_v13  ;;  %v1121_v24 = vmul.f32 %v1977_v28, %v1041_v13  ;;  %v1181_v50 = vmul.f32 %v1985_v31, %v1041_v13  ;;  %v2026_v62 = vld [vmem:[%s3127_s3 + $0x1e8] sm:$0xff]  ;;  %v1051_v27 = vld [vmem:[%s3127_s3 + $0x30] sm:$0xff] }
 0x159   : > { %v2033_v21 = vld [vmem:[%s3127_s3 + $0x220] sm:$0xff]  ;;  %v1036_v57 = vadd.f32 %v1027_v37, %v1004_v47  ;;  %v2865_v58 = vmul.f32 %v1993_v32, %v1041_v13  ;;  %v2867_v6 = vmul.f32 %v2001_v18, %v1041_v13  ;;  %v2869_v22 = vmul.f32 %v2009_v40, %v1041_v13  ;;  %v2034_v36 = vld [vmem:[%s3127_s3 + $0x228] sm:$0xff]  ;;  %v1979_v28 = vld [vmem:[%s3127_s3 + $0x70] sm:$0xff] }
 0x15a   : > { %v2041_v15 = vld [vmem:[%s3127_s3 + $0x260] sm:$0xff]  ;;  %v2871_v44 = vmul.f32 %v2017_v4, %v1041_v13  ;;  %v2882_v45 = vmul.f32 %v2025_v48, %v1041_v13  ;;  %v2884_v46 = vmul.f32 %v2033_v21, %v1041_v13  ;;  %v1042_v61 = vmax.f32 %v1034_v51, 0.0  ;;  %v2042_v11 = vld [vmem:[%s3127_s3 + $0x268] sm:$0xff]  ;;  %v2003_v40 = vld [vmem:[%s3127_s3 + $0x130] sm:$0xff] }
 0x15b   : > { %v2895_v41 = vmax.f32 %v1035_v20, 0.0  ;;  %v2897_v26 = vmul.f32 %v2041_v15, %v1041_v13  ;;  %v1062_v33 = vadd.f32 %v2726_v63, %v1057_v43  ;;  %v1126_v31 = vadd.f32 %v2729_v1, %v1121_v24  ;;  %v1995_v13 = vld [vmem:[%s3127_s3 + $0xf0] sm:$0xff] }
 0x15c   : > { %v1186_v32 = vadd.f32 %v2732_v2, %v1181_v50  ;;  %v1058_v18 = vmul.f32 %v1050_v49, %v1042_v61  ;;  %v1122_v37 = vmul.f32 %v1978_v9, %v1042_v61  ;;  %v1182_v47 = vmul.f32 %v1986_v10, %v1042_v61  ;;  %v2011_v4 = vld [vmem:[%s3127_s3 + $0x170] sm:$0xff]  ;;  %v1052_v9 = vld [vmem:[%s3127_s3 + $0x38] sm:$0xff] }
 0x15d   : > { %3137 = vst [vmem:[#allocation6_spill] sm:$0xff] %v2897_v26  ;;  %v2920_v63 = vmax.f32 %v1036_v57, 0.0  ;;  %v1242_v1 = vmul.f32 %v1994_v30, %v1042_v61  ;;  %v2922_v48 = vmul.f32 %v2002_v60, %v1042_v61  ;;  %v2924_v2 = vmul.f32 %v2010_v3, %v1042_v61  ;;  %v2019_v20 = vld [vmem:[%s3127_s3 + $0x1b0] sm:$0xff]  ;;  %v1980_v10 = vld [vmem:[%s3127_s3 + $0x78] sm:$0xff] }
 0x15e   : > { %v2926_v51 = vmul.f32 %v2018_v54, %v1042_v61  ;;  %v2027_v21 = vld [vmem:[%s3127_s3 + $0x1f0] sm:$0xff]  ;;  %v2937_v49 = vmul.f32 %v2026_v62, %v1042_v61  ;;  %v2939_v43 = vmul.f32 %v2034_v36, %v1042_v61  ;;  %v1059_v24 = vmul.f32 %v1051_v27, %v2895_v41  ;;  %v1988_v54 = vld [vmem:[%s3127_s3 + $0xb8] sm:$0xff] }
 0x15f   : > { %v2035_v15 = vld [vmem:[%s3127_s3 + $0x230] sm:$0xff]  ;;  %v1123_v50 = vmul.f32 %v1979_v28, %v2895_v41  ;;  %v2949_v30 = vmul.f32 %v2042_v11, %v1042_v61  ;;  %v1183_v57 = vmul.f32 %v1987_v29, %v2895_v41  ;;  %v1243_v60 = vmul.f32 %v1995_v13, %v2895_v41 }
 0x160   : > { %v2954_v3 = vmul.f32 %v2003_v40, %v2895_v41  ;;  %v2960_v62 = vmul.f32 %v2011_v4, %v2895_v41  ;;  %v2963_v36 = vmul.f32 %v2019_v20, %v2895_v41  ;;  %v2966_v61 = vmul.f32 %v2027_v21, %v2895_v41 }
 0x161   : > { %3138 = vst [vmem:[#allocation7_spill] sm:$0xff] %v2949_v30  ;;  %v2969_v11 = vmul.f32 %v2035_v15, %v2895_v41  ;;  %v1060_v27 = vmul.f32 %v1052_v9, %v2920_v63  ;;  %v1063_v28 = vadd.f32 %v1062_v33, %v1059_v24  ;;  %v1074_v29 = vsel %vm1070_vm3, %v1058_v18, 0.0  ;;  %v1996_v33 = vld [vmem:[%s3127_s3 + $0xf8] sm:$0xff] }
 0x162   : > { %v1124_v13 = vmul.f32 %v1980_v10, %v2920_v63  ;;  %v1075_v40 = vadd.f32 %v1074_v29, %v2815_v7  ;;  %v1127_v4 = vadd.f32 %v1126_v31, %v1123_v50  ;;  %v1137_v30 = vsel %vm1070_vm3, %v1122_v37, 0.0 }
 0x163   : > { %v1184_v20 = vmul.f32 %v1988_v54, %v2920_v63  ;;  %v1064_v53 = vrot.slane %v1063_v28, 4  ;;  %v1076_v21 = vsel %vm1070_vm3, %v1060_v27, 0.0  ;;  %v1138_v15 = vadd.f32 %v1137_v30, %v2818_v0 }
 0x164   : > { %v1139_v5 = vsel %vm1070_vm3, %v1124_v13, 0.0  ;;  %v1077_v18 = vadd.f32 %v1076_v21, %v1075_v40  ;;  %v1128_v24 = vrot.slane %v1127_v4, 4  ;;  %v1187_v9 = vadd.f32 %v1186_v32, %v1183_v57 }
 0x165   : > { %v1197_v7 = vsel %vm1070_vm3, %v1182_v47, 0.0  ;;  %v1065_v31 = vadd.f32 %v1064_v53, %v1063_v28  ;;  %v1140_v37 = vadd.f32 %v1139_v5, %v1138_v15  ;;  %v1199_v10 = vsel %vm1070_vm3, %v1184_v20, 0.0 }
 0x166   : > { %v1198_v50 = vadd.f32 %v1197_v7, %v2821_v38  ;;  %v1078_v54 = vrot.slane %v1077_v18, 4  ;;  %v1129_v27 = vadd.f32 %v1128_v24, %v1127_v4  ;;  %v1188_v0 = vrot.slane %v1187_v9, 4 }
 0x167   : > { %v1244_v30 = vmul.f32 %v1996_v33, %v2920_v63  ;;  %v1066_v29 = vrot.slane %v1065_v31, 2  ;;  %v1141_v13 = vrot.slane %v1140_v37, 4  ;;  %v1246_v40 = vadd.f32 %v2742_v14, %v2865_v58 }
 0x168   : > { %v1200_v34 = vadd.f32 %v1199_v10, %v1198_v50  ;;  %v1079_v32 = vadd.f32 %v1078_v54, %v1077_v18  ;;  %v1130_v57 = vrot.slane %v1129_v27, 2  ;;  %v1189_v47 = vadd.f32 %v1188_v0, %v1187_v9 }
 0x169   : > { %v1257_v5 = vsel %vm1070_vm3, %v1242_v1, 0.0  ;;  %v1067_v53 = vadd.f32 %v1066_v29, %v1065_v31  ;;  %v1142_v38 = vadd.f32 %v1141_v13, %v1140_v37  ;;  %v1247_v20 = vadd.f32 %v1246_v40, %v1243_v60  ;;  %v2004_v1 = vld [vmem:[%s3127_s3 + $0x138] sm:$0xff]  ;;  %v1675_v31 = vld [vmem:[%s3129_s5 + $0x8] sm:$0x3] }
 0x16a   : > { %v1201_v28 = vrot.slane %v1200_v34, 4  ;;  %v1080_v21 = vrot.slane %v1079_v32, 2  ;;  %v1131_v4 = vadd.f32 %v1130_v57, %v1129_v27  ;;  %v1190_v15 = vrot.slane %v1189_v47, 2 }
 0x16b   : > { %v1258_v33 = vadd.f32 %v1257_v5, %v2833_v52  ;;  %v1068_v24 = vrot.slane %v1067_v53, 1  ;;  %v1143_v7 = vrot.slane %v1142_v38, 2  ;;  %v1248_v10 = vrot.slane %v1247_v20, 4 }
 0x16c   : > { %v1202_v50 = vadd.f32 %v1201_v28, %v1200_v34  ;;  %v1081_v26 = vadd.f32 %v1080_v21, %v1079_v32  ;;  %v1132_v14 = vrot.slane %v1131_v4, 1  ;;  %v1191_v58 = vadd.f32 %v1190_v15, %v1189_v47 }
 0x16d   : > { %v1259_v18 = vsel %vm1070_vm3, %v1244_v30, 0.0  ;;  %v1069_v9 = vadd.f32 %v1068_v24, %v1067_v53  ;;  %v3139_v60 = vlaneseq  ;;  %v1144_v52 = vadd.f32 %v1143_v7, %v1142_v38 }
 0x16e   : > { %v1203_v37 = vrot.slane %v1202_v50, 2  ;;  %v1249_v54 = vadd.f32 %v1248_v10, %v1247_v20  ;;  %v1082_v34 = vrot.slane %v1081_v26, 1  ;;  %v1133_v27 = vadd.f32 %v1132_v14, %v1131_v4 }
 0x16f   : > { %vm2996_vm4 = vcmp.lt.s32.totalorder %v3139_v60, 176  ;;  %v1192_v0 = vrot.slane %v1191_v58, 1  ;;  %v1260_v29 = vadd.f32 %v1259_v18, %v1258_v33  ;;  %v1145_v13 = vrot.slane %v1144_v52, 1 }
 0x170   : > { %v1204_v40 = vadd.f32 %v1203_v37, %v1202_v50  ;;  %v1250_v30 = vrot.slane %v1249_v54, 2  ;;  %v1304_v32 = vmul.f32 %v2004_v1, %v2920_v63  ;;  %v1083_v57 = vadd.f32 %v1082_v34, %v1081_v26  ;;  %v2012_v26 = vld [vmem:[%s3127_s3 + $0x178] sm:$0xff] }
 0x171   : > { %v1193_v47 = vadd.f32 %v1192_v0, %v1191_v58  ;;  %v1261_v5 = vrot.slane %v1260_v29, 4  ;;  %v1306_v53 = vadd.f32 %v2756_v8, %v2867_v6  ;;  %v1146_v28 = vadd.f32 %v1145_v13, %v1144_v52 }
 0x172   : > { %v1205_v21 = vrot.slane %v1204_v40, 1  ;;  %v1251_v38 = vadd.f32 %v1250_v30, %v1249_v54  ;;  %v1317_v20 = vsel %vm1070_vm3, %v2922_v48, 0.0  ;;  %v1086_v4 = vcombine.low %v1069_v9, %v1083_v57  ;;  %v2020_v54 = vld [vmem:[%s3127_s3 + $0x1b8] sm:$0xff] }
 0x173   : > { %v1262_v15 = vadd.f32 %v1261_v5, %v1260_v29  ;;  %v1307_v33 = vadd.f32 %v1306_v53, %v2954_v3  ;;  %v1318_v24 = vadd.f32 %v1317_v20, %v2848_v39  ;;  %v1149_v7 = vcombine.low %v1133_v27, %v1146_v28 }
 0x174   : > { %v1206_v50 = vadd.f32 %v1205_v21, %v1204_v40  ;;  %v1252_v10 = vrot.slane %v1251_v38, 1  ;;  %v1319_v8 = vsel %vm1070_vm3, %v1304_v32, 0.0  ;;  %v1093_v6 = vrot.slane %v1086_v4, %v2595_v12  ;;  %v2028_v21 = vld [vmem:[%s3127_s3 + $0x1f8] sm:$0xff] }
 0x175   : > { %v1263_v14 = vrot.slane %v1262_v15, 2  ;;  %v1308_v58 = vrot.slane %v1307_v33, 4  ;;  %v1320_v48 = vadd.f32 %v1319_v8, %v1318_v24  ;;  %v1156_v18 = vrot.slane %v1149_v7, %v2595_v12 }
 0x176   : > { %v1209_v1 = vcombine.low %v1193_v47, %v1206_v50  ;;  %v1253_v3 = vadd.f32 %v1252_v10, %v1251_v38  ;;  %v1364_v39 = vmul.f32 %v2012_v26, %v2920_v63  ;;  %v1100_v9 = vrot.slane %v1093_v6, %v2595_v12 }
 0x177   : > { %v1264_v60 = vadd.f32 %v1263_v14, %v1262_v15  ;;  %v1309_v52 = vadd.f32 %v1308_v58, %v1307_v33  ;;  %v1321_v37 = vrot.slane %v1320_v48, 4  ;;  %v1163_v34 = vrot.slane %v1156_v18, %v2595_v12 }
 0x178   : > { %v1216_v27 = vrot.slane %v1209_v1, %v2595_v12  ;;  %v1366_v0 = vadd.f32 %v2759_v17, %v2869_v22  ;;  %v1377_v29 = vsel %vm1070_vm3, %v2924_v2, 0.0  ;;  %1106 = vst.msk [vmem:[#allocation2] ss:$8 sm:$0x3] %vm2996_vm4, %v1100_v9  ;;  %v1379_v17 = vsel %vm1070_vm3, %v1364_v39, 0.0 }
 0x179   : > { %v1265_v13 = vrot.slane %v1264_v60, 1  ;;  %v1310_v40 = vrot.slane %v1309_v52, 2  ;;  %v1322_v30 = vadd.f32 %v1321_v37, %v1320_v48  ;;  %v1378_v32 = vadd.f32 %v1377_v29, %v2851_v56  ;;  %1166 = vst.msk [vmem:[#allocation2 + $0x1] ss:$8 sm:$0x3] %vm2996_vm4, %v1163_v34 }
 0x17a   : > { %v1223_v57 = vrot.slane %v1216_v27, %v2595_v12  ;;  %v1367_v47 = vadd.f32 %v1366_v0, %v2960_v62  ;;  %v1424_v22 = vmul.f32 %v2020_v54, %v2920_v63  ;;  %v1426_v38 = vadd.f32 %v2766_v55, %v2871_v44 }
 0x17b   : > { %v1266_v2 = vadd.f32 %v1265_v13, %v1264_v60  ;;  %v1311_v5 = vadd.f32 %v1310_v40, %v1309_v52  ;;  %v1323_v53 = vrot.slane %v1322_v30, 2  ;;  %v1380_v28 = vadd.f32 %v1379_v17, %v1378_v32  ;;  %v2036_v52 = vld [vmem:[%s3127_s3 + $0x238] sm:$0xff] }
 0x17c   : > { %1226 = vst.msk [vmem:[#allocation2 + $0x2] ss:$8 sm:$0x3] %vm2996_vm4, %v1223_v57  ;;  %v1368_v56 = vrot.slane %v1367_v47, 4  ;;  %v1437_v62 = vsel %vm1070_vm3, %v2926_v51, 0.0  ;;  %v1439_v20 = vsel %vm1070_vm3, %v1424_v22, 0.0  ;;  %v1427_v7 = vadd.f32 %v1426_v38, %v2963_v36 }
 0x17d   : > { %v1269_v4 = vcombine.low %v1253_v3, %v1266_v2  ;;  %v1312_v15 = vrot.slane %v1311_v5, 1  ;;  %v1324_v33 = vadd.f32 %v1323_v53, %v1322_v30  ;;  %v1381_v24 = vrot.slane %v1380_v28, 4 }
 0x17e   : > { %v1369_v26 = vadd.f32 %v1368_v56, %v1367_v47  ;;  %v1438_v50 = vadd.f32 %v1437_v62, %v2854_v23  ;;  %v1484_v10 = vmul.f32 %v2028_v21, %v2920_v63  ;;  %v1428_v51 = vrot.slane %v1427_v7, 4 }
 0x17f   : > { %v1276_v8 = vrot.slane %v1269_v4, %v2595_v12  ;;  %v1313_v6 = vadd.f32 %v1312_v15, %v1311_v5  ;;  %v1325_v55 = vrot.slane %v1324_v33, 1  ;;  %v1382_v44 = vadd.f32 %v1381_v24, %v1380_v28 }
 0x180   : > { %v1370_v14 = vrot.slane %v1369_v26, 2  ;;  %v1440_v58 = vadd.f32 %v1439_v20, %v1438_v50  ;;  %v1486_v48 = vadd.f32 %v2768_v59, %v2882_v45  ;;  %v1496_v23 = vadd.f32 %v2772_v19, %v2693_v35 }
 0x181   : > { %v1283_v18 = vrot.slane %v1276_v8, %v2595_v12  ;;  %v1326_v1 = vadd.f32 %v1325_v55, %v1324_v33  ;;  %v1383_v3 = vrot.slane %v1382_v44, 2  ;;  %v1429_v39 = vadd.f32 %v1428_v51, %v1427_v7  ;;  %v3142_v55 = vld [vmem:[#allocation6_spill] sm:$0xff] }
 0x182   : > { %v1371_v36 = vadd.f32 %v1370_v14, %v1369_v26  ;;  %v1441_v9 = vrot.slane %v1440_v58, 4  ;;  %v1487_v60 = vadd.f32 %v1486_v48, %v2966_v61  ;;  %v1497_v37 = vsel %vm1070_vm3, %v2937_v49, 0.0  ;;  %v2043_v49 = vld [vmem:[%s3127_s3 + $0x270] sm:$0xff]  ;;  %v3144_v48 = vld [vmem:[#allocation3_spill] sm:$0xff] }
 0x183   : > { %1286 = vst.msk [vmem:[#allocation2 + $0x3] ss:$8 sm:$0x3] %vm2996_vm4, %v1283_v18  ;;  %v1329_v59 = vcombine.low %v1313_v6, %v1326_v1  ;;  %v1384_v45 = vadd.f32 %v1383_v3, %v1382_v44  ;;  %v1499_v54 = vsel %vm1070_vm3, %v1484_v10, 0.0  ;;  %v1430_v19 = vrot.slane %v1429_v39, 2  ;;  %v3145_v18 = vld [vmem:[#allocation5_spill] sm:$0xff] }
 0x184   : > { %v1372_v35 = vrot.slane %v1371_v36, 1  ;;  %v1442_v34 = vadd.f32 %v1441_v9, %v1440_v58  ;;  %v1488_v27 = vrot.slane %v1487_v60, 4  ;;  %v1498_v29 = vadd.f32 %v1497_v37, %v1496_v23 }
 0x185   : > { %v1336_v61 = vrot.slane %v1329_v59, %v2595_v12  ;;  %v1385_v0 = vrot.slane %v1384_v45, 1  ;;  %v1544_v13 = vmul.f32 %v2036_v52, %v2920_v63  ;;  %v1431_v30 = vadd.f32 %v1430_v19, %v1429_v39 }
 0x186   : > { %v1373_v40 = vadd.f32 %v1372_v35, %v1371_v36  ;;  %v1443_v32 = vrot.slane %v1442_v34, 2  ;;  %v1489_v57 = vadd.f32 %v1488_v27, %v1487_v60  ;;  %v1500_v22 = vadd.f32 %v1499_v54, %v1498_v29 }
 0x187   : > { %v1343_v47 = vrot.slane %v1336_v61, %v2595_v12  ;;  %v1386_v17 = vadd.f32 %v1385_v0, %v1384_v45  ;;  %v1546_v2 = vadd.f32 %v2784_v16, %v2884_v46  ;;  %v1432_v5 = vrot.slane %v1431_v30, 1  ;;  %v2044_v16 = vld [vmem:[%s3127_s3 + $0x278] sm:$0xff] }
 0x188   : > { %v1444_v53 = vadd.f32 %v1443_v32, %v1442_v34  ;;  %v1490_v28 = vrot.slane %v1489_v57, 2  ;;  %v1556_v21 = vadd.f32 %v2794_v25, %v2702_v42  ;;  %v1501_v38 = vrot.slane %v1500_v22, 4 }
 0x189   : > { %1346 = vst.msk [vmem:[#allocation2 + $0x4] ss:$8 sm:$0x3] %vm2996_vm4, %v1343_v47  ;;  %v1389_v56 = vcombine.low %v1373_v40, %v1386_v17  ;;  %v1547_v62 = vadd.f32 %v1546_v2, %v2969_v11  ;;  %v1557_v20 = vsel %vm1070_vm3, %v2939_v43, 0.0  ;;  %v1603_v46 = vmul.f32 %v2043_v49, %v2895_v41  ;;  %v3143_v41 = vld [vmem:[#allocation4_spill] sm:$0xff] }
 0x18a   : > { %v1445_v4 = vrot.slane %v1444_v53, 1  ;;  %v1491_v15 = vadd.f32 %v1490_v28, %v1489_v57  ;;  %v1558_v33 = vadd.f32 %v1557_v20, %v1556_v21  ;;  %v1502_v25 = vadd.f32 %v1501_v38, %v1500_v22 }
 0x18b   : > { %v1396_v42 = vrot.slane %v1389_v56, %v2595_v12  ;;  %v1548_v24 = vrot.slane %v1547_v62, 4  ;;  %v1559_v26 = vsel %vm1070_vm3, %v1544_v13, 0.0  ;;  %v1433_v7 = vadd.f32 %v1432_v5, %v1431_v30 }
 0x18c   : > { %v1446_v11 = vadd.f32 %v1445_v4, %v1444_v53  ;;  %v1560_v50 = vadd.f32 %v1559_v26, %v1558_v33  ;;  %v1604_v43 = vmul.f32 %v2044_v16, %v2920_v63  ;;  %v1503_v8 = vrot.slane %v1502_v25, 2  ;;  %v3146_v63 = vld [vmem:[#allocation7_spill] sm:$0xff] }
 0x18d   : > { %v1403_v10 = vrot.slane %v1396_v42, %v2595_v12  ;;  %v1549_v6 = vadd.f32 %v1548_v24, %v1547_v62  ;;  %v1606_v44 = vadd.f32 %v3143_v41, %v3142_v55  ;;  %v1492_v51 = vrot.slane %v1491_v15, 1 }
 0x18e   : > { %v1449_v14 = vcombine.low %v1433_v7, %v1446_v11  ;;  %v1561_v58 = vrot.slane %v1560_v50, 4  ;;  %v1616_v1 = vadd.f32 %v3145_v18, %v3144_v48  ;;  %v1504_v3 = vadd.f32 %v1503_v8, %v1502_v25  ;;  %v1674_v7 = vld [vmem:[%s3129_s5] sm:$0xff] }
 0x18f   : > { %1406 = vst.msk [vmem:[#allocation2 + $0x5] ss:$8 sm:$0x3] %vm2996_vm4, %v1403_v10  ;;  %v1550_v23 = vrot.slane %v1549_v6, 2  ;;  %v1607_v36 = vadd.f32 %v1606_v44, %v1603_v46  ;;  %v1617_v39 = vsel %vm1070_vm3, %v3146_v63, 0.0  ;;  %v1619_v59 = vsel %vm1070_vm3, %v1604_v43, 0.0 }
 0x190   : > { %v1456_v9 = vrot.slane %v1449_v14, %v2595_v12  ;;  %v1562_v60 = vadd.f32 %v1561_v58, %v1560_v50  ;;  %v1618_v52 = vadd.f32 %v1617_v39, %v1616_v1  ;;  %v1505_v45 = vrot.slane %v1504_v3, 1 }
 0x191   : > { %v1551_v37 = vadd.f32 %v1550_v23, %v1549_v6  ;;  %v1608_v54 = vrot.slane %v1607_v36, 4  ;;  %v1493_v27 = vadd.f32 %v1492_v51, %v1491_v15 }
 0x192   : > { %v1463_v35 = vrot.slane %v1456_v9, %v2595_v12  ;;  %v1563_v19 = vrot.slane %v1562_v60, 2  ;;  %v1620_v34 = vadd.f32 %v1619_v59, %v1618_v52  ;;  %v1506_v61 = vadd.f32 %v1505_v45, %v1504_v3 }
 0x193   : > { %v1609_v0 = vadd.f32 %v1608_v54, %v1607_v36  ;;  %v1552_v29 = vrot.slane %v1551_v37, 1 }
 0x194   : > { %1466 = vst.msk [vmem:[#allocation2 + $0x6] ss:$8 sm:$0x3] %vm2996_vm4, %v1463_v35  ;;  %v1564_v13 = vadd.f32 %v1563_v19, %v1562_v60  ;;  %v1621_v40 = vrot.slane %v1620_v34, 4  ;;  %v1509_v30 = vcombine.low %v1493_v27, %v1506_v61 }
 0x195   : > { %v1610_v32 = vrot.slane %v1609_v0, 2  ;;  %v1553_v22 = vadd.f32 %v1552_v29, %v1551_v37 }
 0x196   : > { %v1565_v57 = vrot.slane %v1564_v13, 1  ;;  %v1622_v49 = vadd.f32 %v1621_v40, %v1620_v34  ;;  %v1516_v47 = vrot.slane %v1509_v30, %v2595_v12 }
 0x197   : > { %v1611_v17 = vadd.f32 %v1610_v32, %v1609_v0 }
 0x198   : > { %v1566_v2 = vadd.f32 %v1565_v57, %v1564_v13  ;;  %v1623_v5 = vrot.slane %v1622_v49, 2  ;;  %v1523_v53 = vrot.slane %v1516_v47, %v2595_v12 }
 0x199   : > { %v1612_v21 = vrot.slane %v1611_v17, 1 }
 0x19a   : > { %v1569_v28 = vcombine.low %v1553_v22, %v1566_v2  ;;  %v1624_v56 = vadd.f32 %v1623_v5, %v1622_v49  ;;  %1526 = vst.msk [vmem:[#allocation2 + $0x7] ss:$8 sm:$0x3] %vm2996_vm4, %v1523_v53 }
 0x19b   : > { %v1613_v16 = vadd.f32 %v1612_v21, %v1611_v17 }
 0x19c   : > { %v1576_v38 = vrot.slane %v1569_v28, %v2595_v12  ;;  %v1625_v62 = vrot.slane %v1624_v56, 1 }
 0x19e   : > { %v1583_v20 = vrot.slane %v1576_v38, %v2595_v12  ;;  %v1626_v46 = vadd.f32 %v1625_v62, %v1624_v56 }
 0x1a0   : > { %1586 = vst.msk [vmem:[#allocation2 + $0x10] ss:$8 sm:$0x3] %vm2996_vm4, %v1583_v20  ;;  %v1629_v4 = vcombine.low %v1613_v16, %v1626_v46 }
 0x1a1   : > { %v1649_v15 = vld [vmem:[#allocation2 + $0x8] sm:$0xff]  ;;  %v1648_v42 = vld [vmem:[#allocation2] sm:$0xff] }
 0x1a2   : > { %v1636_v33 = vrot.slane %v1629_v4, %v2595_v12  ;;  %2045 = vmatprep.mubr.msk.f32.mxu0 %vm1070_vm3, %v1649_v15 }
 0x1a3   : > { %1747 = vmatmul.mubr.f32.vlgmr.msra.gmra.mrb[16].mxu0 %v1648_v42 }
 0x1a4   : > { %v1643_v25 = vrot.slane %v1636_v33, %v2595_v12 }
 0x1a6   : > { %1646 = vst.msk [vmem:[#allocation2 + $0x11] ss:$8 sm:$0x3] %vm2996_vm4, %v1643_v25 }
 0x1ad   : > { %v1651_v24 = vld [vmem:[#allocation2 + $0x18] sm:$0x3]  ;;  %v1650_v26 = vld [vmem:[#allocation2 + $0x10] sm:$0x3] }
 0x1ae   : > { %2046 = vmatprep.mubr.msk.f32.mxu1 %vm1070_vm3, %v1651_v24 }
 0x1af   : > { %1752 = vmatmul.mubr.f32.vlgmr.msra.gmra.mrb[16].mxu1 %v1650_v26 }
 0x276   : > { %v1748_v11 = vpop.f32.mrb[16].mxu0 }
 0x277   : > { %v1749_v12 = vadd.f32 %v1748_v11, %v1674_v7  ;;  %v1750_v50 = vpop.f32.mrb[17].mxu0 }
 0x279   : > { %1758 = vst.msk [vmem:[%s251_s8] sm:$0xff] %vm1757_vm5, %v1749_v12 }
 0x282   : > { %v1753_v43 = vpop.f32.mrb[16].mxu1 }
 0x283   : > { %v1754_v10 = vadd.f32 %v1753_v43, %v1675_v31  ;;  %v1755_v8 = vpop.f32.mrb[17].mxu1 }
 0x285   : > { %1760 = vst.msk [vmem:[%s251_s8 + $0x8] sm:$0x3] %vm1759_vm6, %v1754_v10 }
 0x286 PF: > { %s16_s21 = sadd.s32 1, %s2248_s21  }
 0x287   : > { %p13_p4 = scmp.ge.s32.totalorder %s16_s21, 4  }
 0x289   :  { %15 = sbr.rel (!%p13_p4) target bundleno = 1 (0x1), region = 95 }

</bundles_post_ra>
